<compile_context>
chip_gen: v6e
topology: v6e:2x2x1
jax: 0.10.0
libtpu: 0.0.40
codegen_flags: <defaults>
</compile_context>

<pallas_src>
import functools

import jax
import jax.numpy as jnp
from jax.experimental import pallas as pl
from jax.experimental.pallas import tpu as pltpu

N_LETTERS = 64     # stand-in for `n_letters`
HIDDEN = 128       # fixed by the module
N_CATEGORIES = 16  # stand-in for len(all_category)


def _lstm_fc_logsoftmax_kernel(
    x_ref,       # (T, I)      bf16  VMEM
    w_ih_ref,    # (I, 4H)     bf16  VMEM  (pre-transposed, gate order [i,f,o,g])
    w_hh_ref,    # (H, 4H)     bf16  VMEM  (pre-transposed, gate order [i,f,o,g])
    b_ref,       # (1, 4H)     f32   VMEM  (b_ih + b_hh, gate order [i,f,o,g])
    w_fc_ref,    # (H, Cp)     bf16  VMEM  (pre-transposed, lane-padded to Cp)
    b_fc_ref,    # (1, Cp)     f32   VMEM  (padded lanes = -1e30)
    hc0_ref,     # (2, H)      f32   VMEM  (row 0 = h0, row 1 = c0)
    logp_ref,    # (T, Cp)     f32   VMEM  out
    hcn_ref,     # (2, H)      f32   VMEM  out (row 0 = h_n, row 1 = c_n)
    h_scratch,   # (T, H)      f32   VMEM  scratch (per-step hidden states)
):
    T = x_ref.shape[0]
    H = hc0_ref.shape[1]

    # ---- Hoisted input projection for ALL timesteps: one MXU matmul, bias folded in. ----
    xw = (
        jnp.dot(x_ref[...], w_ih_ref[...], preferred_element_type=jnp.float32)
        + b_ref[...]
    )                                                   # (T, 4H) f32
    # Pre-split into per-step rows (no dependence on h -> off the serial critical path).
    xw_rows = [xw[t:t + 1, :] for t in range(T)]

    w_hh = w_hh_ref[...]                                # (H, 4H) bf16, loop-invariant

    # State carried as register values; written back to VMEM once after the loop.
    h = hc0_ref[0:1, :]                                 # (1, H) f32
    c = hc0_ref[1:2, :]                                 # (1, H) f32

    # T is static at trace time -> fully unrolled recurrence; only h @ W_hh + the gate
    # nonlinearities remain on the serial dependence chain.
    for t in range(T):
        gates = xw_rows[t] + jnp.dot(
            h.astype(w_hh.dtype), w_hh, preferred_element_type=jnp.float32
        )                                               # (1, 4H) f32, gate order [i, f, o, g]

        # Collapsed activations: one sigmoid over the [i|f|o] block, one tanh over g.
        sig = jax.nn.sigmoid(gates[:, : 3 * H])
        i_g = sig[:, 0 * H:1 * H]
        f_g = sig[:, 1 * H:2 * H]
        o_g = sig[:, 2 * H:3 * H]
        g_g = jnp.tanh(gates[:, 3 * H:])

        c = f_g * c + i_g * g_g
        h = o_g * jnp.tanh(c)

        # Row store overlaps with the next step's MXU work (static index -> cheap).
        h_scratch[t:t + 1, :] = h

    hcn_ref[...] = jnp.concatenate([h, c], axis=0)

    # ---- Batched FC + log_softmax over all T hidden states (lane-dense, single store). ----
    h_all = h_scratch[...].astype(w_fc_ref.dtype)                        # (T, H) bf16
    logits = (
        jnp.dot(h_all, w_fc_ref[...], preferred_element_type=jnp.float32)
        + b_fc_ref[...]
    )                                                                    # (T, Cp) f32
    m = jnp.max(logits, axis=-1, keepdims=True)
    lse = m + jnp.log(jnp.sum(jnp.exp(logits - m), axis=-1, keepdims=True))
    logp_ref[...] = logits - lse


def _round_up(n, m):
    return ((n + m - 1) // m) * m


def _reorder_gates_ifgo_to_ifog(w):
    """Permute the last axis gate blocks from PyTorch's [i, f, g, o] to [i, f, o, g]."""
    i, f, g, o = jnp.split(w, 4, axis=-1)
    return jnp.concatenate([i, f, o, g], axis=-1)


def prepare_params(params, hidden=HIDDEN):
    """One-time weight prep (outside the per-call path): transpose, gate reorder, bf16 cast,
    bias fold, FC lane-padding.  Returns (prepped_dict, n_categories)."""
    H = hidden
    C = params["w_fc"].shape[0]
    Cp = max(128, _round_up(C, 128))  # lane-dense output slab; sliced back to C in the wrapper

    w_ih_t = _reorder_gates_ifgo_to_ifog(params["w_ih"].T).astype(jnp.bfloat16)      # (I, 4H)
    w_hh_t = _reorder_gates_ifgo_to_ifog(params["w_hh"].T).astype(jnp.bfloat16)      # (H, 4H)
    b_comb = _reorder_gates_ifgo_to_ifog(
        (params["b_ih"] + params["b_hh"]).astype(jnp.float32).reshape(1, 4 * H)
    )                                                                                 # (1, 4H)
    w_fc_p = (
        jnp.zeros((H, Cp), jnp.bfloat16)
        .at[:, :C].set(params["w_fc"].T.astype(jnp.bfloat16))
    )
    b_fc_p = (
        jnp.full((1, Cp), -1e30, jnp.float32)                # padded logits -> exp underflows to 0
        .at[0, :C].set(params["b_fc"].astype(jnp.float32))
    )
    prepped = {
        "w_ih_t": w_ih_t,
        "w_hh_t": w_hh_t,
        "b_comb": b_comb,
        "w_fc_p": w_fc_p,
        "b_fc_p": b_fc_p,
    }
    return prepped, C


@functools.partial(jax.jit, static_argnames=("n_cat",))
def lstm_model_forward(x, hidden_and_c, prepped, *, n_cat):
    """Mirrors LSTM_Model.forward.

    x:            (T, n_letters)  float32
    hidden_and_c: ((1, 1, H), (1, 1, H)) float32
    prepped:      output of prepare_params (pre-transposed / reordered / padded weights)
    returns (log_probs (1, T, C), (h_n (1, 1, H), c_n (1, 1, H)))
    """
    h0, c0 = hidden_and_c
    T = x.shape[0]
    H = HIDDEN
    Cp = prepped["w_fc_p"].shape[1]

    hc0 = jnp.concatenate(
        [h0.reshape(1, H), c0.reshape(1, H)], axis=0
    ).astype(jnp.float32)                                               # (2, H)

    vmem = pl.BlockSpec(memory_space=pltpu.MemorySpace.VMEM)

    logp_pad, hcn = pl.pallas_call(
        _lstm_fc_logsoftmax_kernel,
        out_shape=(
            jax.ShapeDtypeStruct((T, Cp), jnp.float32),
            jax.ShapeDtypeStruct((2, H), jnp.float32),
        ),
        in_specs=[vmem] * 7,
        out_specs=(vmem, vmem),
        scratch_shapes=[pltpu.VMEM((T, H), jnp.float32)],
    )(
        x.astype(jnp.bfloat16),
        prepped["w_ih_t"],
        prepped["w_hh_t"],
        prepped["b_comb"],
        prepped["w_fc_p"],
        prepped["b_fc_p"],
        hc0,
    )

    logp = logp_pad[:, :n_cat]
    h_n = hcn[0:1, :][None, :, :]
    c_n = hcn[1:2, :][None, :, :]
    return logp[None, :, :], (h_n, c_n)


def init_params(key, n_letters=N_LETTERS, hidden=HIDDEN, n_cat=N_CATEGORIES):
    """Deterministic parameter init matching the shapes nn.LSTM / nn.Linear would create."""
    ks = jax.random.split(key, 6)
    k = 1.0 / jnp.sqrt(hidden)
    u = lambda kk, shape, bound: jax.random.uniform(kk, shape, jnp.float32, -bound, bound)
    kf = 1.0 / jnp.sqrt(hidden)  # fan_in of the fc layer
    return {
        "w_ih": u(ks[0], (4 * hidden, n_letters), k),
        "w_hh": u(ks[1], (4 * hidden, hidden), k),
        "b_ih": u(ks[2], (4 * hidden,), k),
        "b_hh": u(ks[3], (4 * hidden,), k),
        "w_fc": u(ks[4], (n_cat, hidden), kf),
        "b_fc": u(ks[5], (n_cat,), kf),
    }


def init_hidden(hidden=HIDDEN):
    return (jnp.zeros((1, 1, hidden), jnp.float32), jnp.zeros((1, 1, hidden), jnp.float32))


if __name__ == "__main__":
    key = jax.random.PRNGKey(0)
    k_param, k_x = jax.random.split(key)

    params = init_params(k_param)
    prepped, n_cat = prepare_params(params)      # one-time prep; not on the per-call path
    jax.block_until_ready(prepped)

    seq_len = 8
    x = jax.random.normal(k_x, (seq_len, N_LETTERS), jnp.float32)
    hidden_and_c = init_hidden()

    log_probs, (h_n, c_n) = lstm_model_forward(x, hidden_and_c, prepped, n_cat=n_cat)
    jax.block_until_ready((log_probs, h_n, c_n))

    assert log_probs.shape == (1, seq_len, N_CATEGORIES)
    assert h_n.shape == (1, 1, HIDDEN) and c_n.shape == (1, 1, HIDDEN)
    # log_softmax rows should sum (in prob space) to ~1
    assert jnp.allclose(jnp.sum(jnp.exp(log_probs), axis=-1), 1.0, atol=1e-4)

    print("KERNEL_OK")
</pallas_src>

<mosaic_0001>
module attributes {stable_mosaic.version = 11 : i64} {
  func.func @_lstm_fc_logsoftmax_kernel(%arg0: memref<8x64xbf16, #tpu.memory_space<vmem>>, %arg1: memref<64x512xbf16, #tpu.memory_space<vmem>>, %arg2: memref<128x512xbf16, #tpu.memory_space<vmem>>, %arg3: memref<1x512xf32, #tpu.memory_space<vmem>>, %arg4: memref<128x128xbf16, #tpu.memory_space<vmem>>, %arg5: memref<1x128xf32, #tpu.memory_space<vmem>>, %arg6: memref<2x128xf32, #tpu.memory_space<vmem>>, %arg7: memref<8x128xf32, #tpu.memory_space<vmem>>, %arg8: memref<2x128xf32, #tpu.memory_space<vmem>>, %arg9: memref<8x128xf32, #tpu.memory_space<vmem>>) attributes {dimension_semantics = [], scalar_prefetch = 0 : i64, scratch_operands = 1 : i64, tpu.core_type = #tpu.core_type<tc>} {
    %c0 = arith.constant 0 : index
    %c0_0 = arith.constant 0 : index
    %0 = vector.load %arg0[%c0, %c0_0] : memref<8x64xbf16, #tpu.memory_space<vmem>>, vector<8x64xbf16>
    %c0_1 = arith.constant 0 : index
    %c0_2 = arith.constant 0 : index
    %1 = vector.load %arg1[%c0_1, %c0_2] : memref<64x512xbf16, #tpu.memory_space<vmem>>, vector<64x512xbf16>
    %cst = arith.constant dense<0.000000e+00> : vector<8x512xf32>
    %2 = tpu.matmul %0, %1, %cst {dimension_numbers = #tpu.dot_dimension_numbers<[1], [0], [0], [1], [0, 0, 1, 1], [], []>} : vector<8x64xbf16>, vector<64x512xbf16>, vector<8x512xf32> -> vector<8x512xf32>
    %c0_3 = arith.constant 0 : index
    %c0_4 = arith.constant 0 : index
    %3 = vector.load %arg3[%c0_3, %c0_4] : memref<1x512xf32, #tpu.memory_space<vmem>>, vector<1x512xf32>
    %4 = vector.broadcast %3 : vector<1x512xf32> to vector<8x512xf32>
    %5 = arith.addf %2, %4 : vector<8x512xf32>
    %6 = vector.extract_strided_slice %5 {offsets = [0, 0], sizes = [1, 512], strides = [1, 1]} : vector<8x512xf32> to vector<1x512xf32>
    %7 = vector.extract_strided_slice %5 {offsets = [1, 0], sizes = [1, 512], strides = [1, 1]} : vector<8x512xf32> to vector<1x512xf32>
    %8 = vector.extract_strided_slice %5 {offsets = [2, 0], sizes = [1, 512], strides = [1, 1]} : vector<8x512xf32> to vector<1x512xf32>
    %9 = vector.extract_strided_slice %5 {offsets = [3, 0], sizes = [1, 512], strides = [1, 1]} : vector<8x512xf32> to vector<1x512xf32>
    %10 = vector.extract_strided_slice %5 {offsets = [4, 0], sizes = [1, 512], strides = [1, 1]} : vector<8x512xf32> to vector<1x512xf32>
    %11 = vector.extract_strided_slice %5 {offsets = [5, 0], sizes = [1, 512], strides = [1, 1]} : vector<8x512xf32> to vector<1x512xf32>
    %12 = vector.extract_strided_slice %5 {offsets = [6, 0], sizes = [1, 512], strides = [1, 1]} : vector<8x512xf32> to vector<1x512xf32>
    %13 = vector.extract_strided_slice %5 {offsets = [7, 0], sizes = [1, 512], strides = [1, 1]} : vector<8x512xf32> to vector<1x512xf32>
    %c0_5 = arith.constant 0 : index
    %c0_6 = arith.constant 0 : index
    %14 = vector.load %arg2[%c0_5, %c0_6] : memref<128x512xbf16, #tpu.memory_space<vmem>>, vector<128x512xbf16>
    %c0_7 = arith.constant 0 : index
    %c0_8 = arith.constant 0 : index
    %15 = vector.load %arg6[%c0_7, %c0_8] : memref<2x128xf32, #tpu.memory_space<vmem>>, vector<1x128xf32>
    %c1 = arith.constant 1 : index
    %c0_9 = arith.constant 0 : index
    %16 = vector.load %arg6[%c1, %c0_9] : memref<2x128xf32, #tpu.memory_space<vmem>>, vector<1x128xf32>
    %17 = arith.truncf %15 : vector<1x128xf32> to vector<1x128xbf16>
    %cst_10 = arith.constant dense<0.000000e+00> : vector<1x512xf32>
    %18 = tpu.matmul %17, %14, %cst_10 {dimension_numbers = #tpu.dot_dimension_numbers<[1], [0], [0], [1], [0, 0, 1, 1], [], []>} : vector<1x128xbf16>, vector<128x512xbf16>, vector<1x512xf32> -> vector<1x512xf32>
    %19 = arith.addf %6, %18 : vector<1x512xf32>
    %20 = vector.extract_strided_slice %19 {offsets = [0, 0], sizes = [1, 384], strides = [1, 1]} : vector<1x512xf32> to vector<1x384xf32>
    %21 = arith.negf %20 : vector<1x384xf32>
    %22 = math.exp %21 : vector<1x384xf32>
    %cst_11 = arith.constant 1.000000e+00 : f32
    %23 = vector.broadcast %cst_11 : f32 to vector<1x384xf32>
    %24 = arith.addf %23, %22 : vector<1x384xf32>
    %25 = arith.divf %23, %24 : vector<1x384xf32>
    %26 = vector.extract_strided_slice %25 {offsets = [0, 0], sizes = [1, 128], strides = [1, 1]} : vector<1x384xf32> to vector<1x128xf32>
    %27 = vector.extract_strided_slice %25 {offsets = [0, 128], sizes = [1, 128], strides = [1, 1]} : vector<1x384xf32> to vector<1x128xf32>
    %28 = vector.extract_strided_slice %25 {offsets = [0, 256], sizes = [1, 128], strides = [1, 1]} : vector<1x384xf32> to vector<1x128xf32>
    %29 = vector.extract_strided_slice %19 {offsets = [0, 384], sizes = [1, 128], strides = [1, 1]} : vector<1x512xf32> to vector<1x128xf32>
    %30 = math.tanh %29 : vector<1x128xf32>
    %31 = arith.mulf %27, %16 : vector<1x128xf32>
    %32 = arith.mulf %26, %30 : vector<1x128xf32>
    %33 = arith.addf %31, %32 : vector<1x128xf32>
    %34 = math.tanh %33 : vector<1x128xf32>
    %35 = arith.mulf %28, %34 : vector<1x128xf32>
    %c0_12 = arith.constant 0 : index
    %c0_13 = arith.constant 0 : index
    %36 = vector.load %arg9[%c0_12, %c0_13] : memref<8x128xf32, #tpu.memory_space<vmem>>, vector<1x128xf32>
    tpu.vector_store %arg9[%c0_12, %c0_13], %35 {strides = array<i32>} : memref<8x128xf32, #tpu.memory_space<vmem>>, vector<1x128xf32>,
    %37 = arith.truncf %35 : vector<1x128xf32> to vector<1x128xbf16>
    %cst_14 = arith.constant dense<0.000000e+00> : vector<1x512xf32>
    %38 = tpu.matmul %37, %14, %cst_14 {dimension_numbers = #tpu.dot_dimension_numbers<[1], [0], [0], [1], [0, 0, 1, 1], [], []>} : vector<1x128xbf16>, vector<128x512xbf16>, vector<1x512xf32> -> vector<1x512xf32>
    %39 = arith.addf %7, %38 : vector<1x512xf32>
    %40 = vector.extract_strided_slice %39 {offsets = [0, 0], sizes = [1, 384], strides = [1, 1]} : vector<1x512xf32> to vector<1x384xf32>
    %41 = arith.negf %40 : vector<1x384xf32>
    %42 = math.exp %41 : vector<1x384xf32>
    %cst_15 = arith.constant 1.000000e+00 : f32
    %43 = vector.broadcast %cst_15 : f32 to vector<1x384xf32>
    %44 = arith.addf %43, %42 : vector<1x384xf32>
    %45 = arith.divf %43, %44 : vector<1x384xf32>
    %46 = vector.extract_strided_slice %45 {offsets = [0, 0], sizes = [1, 128], strides = [1, 1]} : vector<1x384xf32> to vector<1x128xf32>
    %47 = vector.extract_strided_slice %45 {offsets = [0, 128], sizes = [1, 128], strides = [1, 1]} : vector<1x384xf32> to vector<1x128xf32>
    %48 = vector.extract_strided_slice %45 {offsets = [0, 256], sizes = [1, 128], strides = [1, 1]} : vector<1x384xf32> to vector<1x128xf32>
    %49 = vector.extract_strided_slice %39 {offsets = [0, 384], sizes = [1, 128], strides = [1, 1]} : vector<1x512xf32> to vector<1x128xf32>
    %50 = math.tanh %49 : vector<1x128xf32>
    %51 = arith.mulf %47, %33 : vector<1x128xf32>
    %52 = arith.mulf %46, %50 : vector<1x128xf32>
    %53 = arith.addf %51, %52 : vector<1x128xf32>
    %54 = math.tanh %53 : vector<1x128xf32>
    %55 = arith.mulf %48, %54 : vector<1x128xf32>
    %c1_16 = arith.constant 1 : index
    %c0_17 = arith.constant 0 : index
    %56 = vector.load %arg9[%c1_16, %c0_17] : memref<8x128xf32, #tpu.memory_space<vmem>>, vector<1x128xf32>
    tpu.vector_store %arg9[%c1_16, %c0_17], %55 {strides = array<i32>} : memref<8x128xf32, #tpu.memory_space<vmem>>, vector<1x128xf32>,
    %57 = arith.truncf %55 : vector<1x128xf32> to vector<1x128xbf16>
    %cst_18 = arith.constant dense<0.000000e+00> : vector<1x512xf32>
    %58 = tpu.matmul %57, %14, %cst_18 {dimension_numbers = #tpu.dot_dimension_numbers<[1], [0], [0], [1], [0, 0, 1, 1], [], []>} : vector<1x128xbf16>, vector<128x512xbf16>, vector<1x512xf32> -> vector<1x512xf32>
    %59 = arith.addf %8, %58 : vector<1x512xf32>
    %60 = vector.extract_strided_slice %59 {offsets = [0, 0], sizes = [1, 384], strides = [1, 1]} : vector<1x512xf32> to vector<1x384xf32>
    %61 = arith.negf %60 : vector<1x384xf32>
    %62 = math.exp %61 : vector<1x384xf32>
    %cst_19 = arith.constant 1.000000e+00 : f32
    %63 = vector.broadcast %cst_19 : f32 to vector<1x384xf32>
    %64 = arith.addf %63, %62 : vector<1x384xf32>
    %65 = arith.divf %63, %64 : vector<1x384xf32>
    %66 = vector.extract_strided_slice %65 {offsets = [0, 0], sizes = [1, 128], strides = [1, 1]} : vector<1x384xf32> to vector<1x128xf32>
    %67 = vector.extract_strided_slice %65 {offsets = [0, 128], sizes = [1, 128], strides = [1, 1]} : vector<1x384xf32> to vector<1x128xf32>
    %68 = vector.extract_strided_slice %65 {offsets = [0, 256], sizes = [1, 128], strides = [1, 1]} : vector<1x384xf32> to vector<1x128xf32>
    %69 = vector.extract_strided_slice %59 {offsets = [0, 384], sizes = [1, 128], strides = [1, 1]} : vector<1x512xf32> to vector<1x128xf32>
    %70 = math.tanh %69 : vector<1x128xf32>
    %71 = arith.mulf %67, %53 : vector<1x128xf32>
    %72 = arith.mulf %66, %70 : vector<1x128xf32>
    %73 = arith.addf %71, %72 : vector<1x128xf32>
    %74 = math.tanh %73 : vector<1x128xf32>
    %75 = arith.mulf %68, %74 : vector<1x128xf32>
    %c2 = arith.constant 2 : index
    %c0_20 = arith.constant 0 : index
    %76 = vector.load %arg9[%c2, %c0_20] : memref<8x128xf32, #tpu.memory_space<vmem>>, vector<1x128xf32>
    tpu.vector_store %arg9[%c2, %c0_20], %75 {strides = array<i32>} : memref<8x128xf32, #tpu.memory_space<vmem>>, vector<1x128xf32>,
    %77 = arith.truncf %75 : vector<1x128xf32> to vector<1x128xbf16>
    %cst_21 = arith.constant dense<0.000000e+00> : vector<1x512xf32>
    %78 = tpu.matmul %77, %14, %cst_21 {dimension_numbers = #tpu.dot_dimension_numbers<[1], [0], [0], [1], [0, 0, 1, 1], [], []>} : vector<1x128xbf16>, vector<128x512xbf16>, vector<1x512xf32> -> vector<1x512xf32>
    %79 = arith.addf %9, %78 : vector<1x512xf32>
    %80 = vector.extract_strided_slice %79 {offsets = [0, 0], sizes = [1, 384], strides = [1, 1]} : vector<1x512xf32> to vector<1x384xf32>
    %81 = arith.negf %80 : vector<1x384xf32>
    %82 = math.exp %81 : vector<1x384xf32>
    %cst_22 = arith.constant 1.000000e+00 : f32
    %83 = vector.broadcast %cst_22 : f32 to vector<1x384xf32>
    %84 = arith.addf %83, %82 : vector<1x384xf32>
    %85 = arith.divf %83, %84 : vector<1x384xf32>
    %86 = vector.extract_strided_slice %85 {offsets = [0, 0], sizes = [1, 128], strides = [1, 1]} : vector<1x384xf32> to vector<1x128xf32>
    %87 = vector.extract_strided_slice %85 {offsets = [0, 128], sizes = [1, 128], strides = [1, 1]} : vector<1x384xf32> to vector<1x128xf32>
    %88 = vector.extract_strided_slice %85 {offsets = [0, 256], sizes = [1, 128], strides = [1, 1]} : vector<1x384xf32> to vector<1x128xf32>
    %89 = vector.extract_strided_slice %79 {offsets = [0, 384], sizes = [1, 128], strides = [1, 1]} : vector<1x512xf32> to vector<1x128xf32>
    %90 = math.tanh %89 : vector<1x128xf32>
    %91 = arith.mulf %87, %73 : vector<1x128xf32>
    %92 = arith.mulf %86, %90 : vector<1x128xf32>
    %93 = arith.addf %91, %92 : vector<1x128xf32>
    %94 = math.tanh %93 : vector<1x128xf32>
    %95 = arith.mulf %88, %94 : vector<1x128xf32>
    %c3 = arith.constant 3 : index
    %c0_23 = arith.constant 0 : index
    %96 = vector.load %arg9[%c3, %c0_23] : memref<8x128xf32, #tpu.memory_space<vmem>>, vector<1x128xf32>
    tpu.vector_store %arg9[%c3, %c0_23], %95 {strides = array<i32>} : memref<8x128xf32, #tpu.memory_space<vmem>>, vector<1x128xf32>,
    %97 = arith.truncf %95 : vector<1x128xf32> to vector<1x128xbf16>
    %cst_24 = arith.constant dense<0.000000e+00> : vector<1x512xf32>
    %98 = tpu.matmul %97, %14, %cst_24 {dimension_numbers = #tpu.dot_dimension_numbers<[1], [0], [0], [1], [0, 0, 1, 1], [], []>} : vector<1x128xbf16>, vector<128x512xbf16>, vector<1x512xf32> -> vector<1x512xf32>
    %99 = arith.addf %10, %98 : vector<1x512xf32>
    %100 = vector.extract_strided_slice %99 {offsets = [0, 0], sizes = [1, 384], strides = [1, 1]} : vector<1x512xf32> to vector<1x384xf32>
    %101 = arith.negf %100 : vector<1x384xf32>
    %102 = math.exp %101 : vector<1x384xf32>
    %cst_25 = arith.constant 1.000000e+00 : f32
    %103 = vector.broadcast %cst_25 : f32 to vector<1x384xf32>
    %104 = arith.addf %103, %102 : vector<1x384xf32>
    %105 = arith.divf %103, %104 : vector<1x384xf32>
    %106 = vector.extract_strided_slice %105 {offsets = [0, 0], sizes = [1, 128], strides = [1, 1]} : vector<1x384xf32> to vector<1x128xf32>
    %107 = vector.extract_strided_slice %105 {offsets = [0, 128], sizes = [1, 128], strides = [1, 1]} : vector<1x384xf32> to vector<1x128xf32>
    %108 = vector.extract_strided_slice %105 {offsets = [0, 256], sizes = [1, 128], strides = [1, 1]} : vector<1x384xf32> to vector<1x128xf32>
    %109 = vector.extract_strided_slice %99 {offsets = [0, 384], sizes = [1, 128], strides = [1, 1]} : vector<1x512xf32> to vector<1x128xf32>
    %110 = math.tanh %109 : vector<1x128xf32>
    %111 = arith.mulf %107, %93 : vector<1x128xf32>
    %112 = arith.mulf %106, %110 : vector<1x128xf32>
    %113 = arith.addf %111, %112 : vector<1x128xf32>
    %114 = math.tanh %113 : vector<1x128xf32>
    %115 = arith.mulf %108, %114 : vector<1x128xf32>
    %c4 = arith.constant 4 : index
    %c0_26 = arith.constant 0 : index
    %116 = vector.load %arg9[%c4, %c0_26] : memref<8x128xf32, #tpu.memory_space<vmem>>, vector<1x128xf32>
    tpu.vector_store %arg9[%c4, %c0_26], %115 {strides = array<i32>} : memref<8x128xf32, #tpu.memory_space<vmem>>, vector<1x128xf32>,
    %117 = arith.truncf %115 : vector<1x128xf32> to vector<1x128xbf16>
    %cst_27 = arith.constant dense<0.000000e+00> : vector<1x512xf32>
    %118 = tpu.matmul %117, %14, %cst_27 {dimension_numbers = #tpu.dot_dimension_numbers<[1], [0], [0], [1], [0, 0, 1, 1], [], []>} : vector<1x128xbf16>, vector<128x512xbf16>, vector<1x512xf32> -> vector<1x512xf32>
    %119 = arith.addf %11, %118 : vector<1x512xf32>
    %120 = vector.extract_strided_slice %119 {offsets = [0, 0], sizes = [1, 384], strides = [1, 1]} : vector<1x512xf32> to vector<1x384xf32>
    %121 = arith.negf %120 : vector<1x384xf32>
    %122 = math.exp %121 : vector<1x384xf32>
    %cst_28 = arith.constant 1.000000e+00 : f32
    %123 = vector.broadcast %cst_28 : f32 to vector<1x384xf32>
    %124 = arith.addf %123, %122 : vector<1x384xf32>
    %125 = arith.divf %123, %124 : vector<1x384xf32>
    %126 = vector.extract_strided_slice %125 {offsets = [0, 0], sizes = [1, 128], strides = [1, 1]} : vector<1x384xf32> to vector<1x128xf32>
    %127 = vector.extract_strided_slice %125 {offsets = [0, 128], sizes = [1, 128], strides = [1, 1]} : vector<1x384xf32> to vector<1x128xf32>
    %128 = vector.extract_strided_slice %125 {offsets = [0, 256], sizes = [1, 128], strides = [1, 1]} : vector<1x384xf32> to vector<1x128xf32>
    %129 = vector.extract_strided_slice %119 {offsets = [0, 384], sizes = [1, 128], strides = [1, 1]} : vector<1x512xf32> to vector<1x128xf32>
    %130 = math.tanh %129 : vector<1x128xf32>
    %131 = arith.mulf %127, %113 : vector<1x128xf32>
    %132 = arith.mulf %126, %130 : vector<1x128xf32>
    %133 = arith.addf %131, %132 : vector<1x128xf32>
    %134 = math.tanh %133 : vector<1x128xf32>
    %135 = arith.mulf %128, %134 : vector<1x128xf32>
    %c5 = arith.constant 5 : index
    %c0_29 = arith.constant 0 : index
    %136 = vector.load %arg9[%c5, %c0_29] : memref<8x128xf32, #tpu.memory_space<vmem>>, vector<1x128xf32>
    tpu.vector_store %arg9[%c5, %c0_29], %135 {strides = array<i32>} : memref<8x128xf32, #tpu.memory_space<vmem>>, vector<1x128xf32>,
    %137 = arith.truncf %135 : vector<1x128xf32> to vector<1x128xbf16>
    %cst_30 = arith.constant dense<0.000000e+00> : vector<1x512xf32>
    %138 = tpu.matmul %137, %14, %cst_30 {dimension_numbers = #tpu.dot_dimension_numbers<[1], [0], [0], [1], [0, 0, 1, 1], [], []>} : vector<1x128xbf16>, vector<128x512xbf16>, vector<1x512xf32> -> vector<1x512xf32>
    %139 = arith.addf %12, %138 : vector<1x512xf32>
    %140 = vector.extract_strided_slice %139 {offsets = [0, 0], sizes = [1, 384], strides = [1, 1]} : vector<1x512xf32> to vector<1x384xf32>
    %141 = arith.negf %140 : vector<1x384xf32>
    %142 = math.exp %141 : vector<1x384xf32>
    %cst_31 = arith.constant 1.000000e+00 : f32
    %143 = vector.broadcast %cst_31 : f32 to vector<1x384xf32>
    %144 = arith.addf %143, %142 : vector<1x384xf32>
    %145 = arith.divf %143, %144 : vector<1x384xf32>
    %146 = vector.extract_strided_slice %145 {offsets = [0, 0], sizes = [1, 128], strides = [1, 1]} : vector<1x384xf32> to vector<1x128xf32>
    %147 = vector.extract_strided_slice %145 {offsets = [0, 128], sizes = [1, 128], strides = [1, 1]} : vector<1x384xf32> to vector<1x128xf32>
    %148 = vector.extract_strided_slice %145 {offsets = [0, 256], sizes = [1, 128], strides = [1, 1]} : vector<1x384xf32> to vector<1x128xf32>
    %149 = vector.extract_strided_slice %139 {offsets = [0, 384], sizes = [1, 128], strides = [1, 1]} : vector<1x512xf32> to vector<1x128xf32>
    %150 = math.tanh %149 : vector<1x128xf32>
    %151 = arith.mulf %147, %133 : vector<1x128xf32>
    %152 = arith.mulf %146, %150 : vector<1x128xf32>
    %153 = arith.addf %151, %152 : vector<1x128xf32>
    %154 = math.tanh %153 : vector<1x128xf32>
    %155 = arith.mulf %148, %154 : vector<1x128xf32>
    %c6 = arith.constant 6 : index
    %c0_32 = arith.constant 0 : index
    %156 = vector.load %arg9[%c6, %c0_32] : memref<8x128xf32, #tpu.memory_space<vmem>>, vector<1x128xf32>
    tpu.vector_store %arg9[%c6, %c0_32], %155 {strides = array<i32>} : memref<8x128xf32, #tpu.memory_space<vmem>>, vector<1x128xf32>,
    %157 = arith.truncf %155 : vector<1x128xf32> to vector<1x128xbf16>
    %cst_33 = arith.constant dense<0.000000e+00> : vector<1x512xf32>
    %158 = tpu.matmul %157, %14, %cst_33 {dimension_numbers = #tpu.dot_dimension_numbers<[1], [0], [0], [1], [0, 0, 1, 1], [], []>} : vector<1x128xbf16>, vector<128x512xbf16>, vector<1x512xf32> -> vector<1x512xf32>
    %159 = arith.addf %13, %158 : vector<1x512xf32>
    %160 = vector.extract_strided_slice %159 {offsets = [0, 0], sizes = [1, 384], strides = [1, 1]} : vector<1x512xf32> to vector<1x384xf32>
    %161 = arith.negf %160 : vector<1x384xf32>
    %162 = math.exp %161 : vector<1x384xf32>
    %cst_34 = arith.constant 1.000000e+00 : f32
    %163 = vector.broadcast %cst_34 : f32 to vector<1x384xf32>
    %164 = arith.addf %163, %162 : vector<1x384xf32>
    %165 = arith.divf %163, %164 : vector<1x384xf32>
    %166 = vector.extract_strided_slice %165 {offsets = [0, 0], sizes = [1, 128], strides = [1, 1]} : vector<1x384xf32> to vector<1x128xf32>
    %167 = vector.extract_strided_slice %165 {offsets = [0, 128], sizes = [1, 128], strides = [1, 1]} : vector<1x384xf32> to vector<1x128xf32>
    %168 = vector.extract_strided_slice %165 {offsets = [0, 256], sizes = [1, 128], strides = [1, 1]} : vector<1x384xf32> to vector<1x128xf32>
    %169 = vector.extract_strided_slice %159 {offsets = [0, 384], sizes = [1, 128], strides = [1, 1]} : vector<1x512xf32> to vector<1x128xf32>
    %170 = math.tanh %169 : vector<1x128xf32>
    %171 = arith.mulf %167, %153 : vector<1x128xf32>
    %172 = arith.mulf %166, %170 : vector<1x128xf32>
    %173 = arith.addf %171, %172 : vector<1x128xf32>
    %174 = math.tanh %173 : vector<1x128xf32>
    %175 = arith.mulf %168, %174 : vector<1x128xf32>
    %c7 = arith.constant 7 : index
    %c0_35 = arith.constant 0 : index
    %176 = vector.load %arg9[%c7, %c0_35] : memref<8x128xf32, #tpu.memory_space<vmem>>, vector<1x128xf32>
    tpu.vector_store %arg9[%c7, %c0_35], %175 {strides = array<i32>} : memref<8x128xf32, #tpu.memory_space<vmem>>, vector<1x128xf32>,
    %177 = tpu.concatenate %175, %173 in 0 : vector<1x128xf32>, vector<1x128xf32> -> vector<2x128xf32>
    %c0_36 = arith.constant 0 : index
    %c0_37 = arith.constant 0 : index
    %178 = vector.load %arg8[%c0_36, %c0_37] : memref<2x128xf32, #tpu.memory_space<vmem>>, vector<2x128xf32>
    tpu.vector_store %arg8[%c0_36, %c0_37], %177 {strides = array<i32>} : memref<2x128xf32, #tpu.memory_space<vmem>>, vector<2x128xf32>,
    %c0_38 = arith.constant 0 : index
    %c0_39 = arith.constant 0 : index
    %179 = vector.load %arg9[%c0_38, %c0_39] : memref<8x128xf32, #tpu.memory_space<vmem>>, vector<8x128xf32>
    %180 = arith.truncf %179 : vector<8x128xf32> to vector<8x128xbf16>
    %c0_40 = arith.constant 0 : index
    %c0_41 = arith.constant 0 : index
    %181 = vector.load %arg4[%c0_40, %c0_41] : memref<128x128xbf16, #tpu.memory_space<vmem>>, vector<128x128xbf16>
    %cst_42 = arith.constant dense<0.000000e+00> : vector<8x128xf32>
    %182 = tpu.matmul %180, %181, %cst_42 {dimension_numbers = #tpu.dot_dimension_numbers<[1], [0], [0], [1], [0, 0, 1, 1], [], []>} : vector<8x128xbf16>, vector<128x128xbf16>, vector<8x128xf32> -> vector<8x128xf32>
    %c0_43 = arith.constant 0 : index
    %c0_44 = arith.constant 0 : index
    %183 = vector.load %arg5[%c0_43, %c0_44] : memref<1x128xf32, #tpu.memory_space<vmem>>, vector<1x128xf32>
    %184 = vector.broadcast %183 : vector<1x128xf32> to vector<8x128xf32>
    %185 = arith.addf %182, %184 : vector<8x128xf32>
    %cst_45 = arith.constant dense<0xFF800000> : vector<8xf32>
    %186 = vector.multi_reduction <maximumf>, %185, %cst_45 [1] : vector<8x128xf32> to vector<8xf32>
    %187 = vector.shape_cast %186 : vector<8xf32> to vector<8x1xf32>
    %188 = vector.broadcast %187 : vector<8x1xf32> to vector<8x128xf32>
    %189 = arith.subf %185, %188 : vector<8x128xf32>
    %190 = math.exp %189 : vector<8x128xf32>
    %cst_46 = arith.constant dense<0.000000e+00> : vector<8xf32>
    %191 = vector.multi_reduction <add>, %190, %cst_46 [1] : vector<8x128xf32> to vector<8xf32>
    %192 = vector.shape_cast %191 : vector<8xf32> to vector<8x1xf32>
    %193 = math.log %192 : vector<8x1xf32>
    %194 = arith.addf %187, %193 : vector<8x1xf32>
    %195 = vector.broadcast %194 : vector<8x1xf32> to vector<8x128xf32>
    %196 = arith.subf %185, %195 : vector<8x128xf32>
    %c0_47 = arith.constant 0 : index
    %c0_48 = arith.constant 0 : index
    %197 = vector.load %arg7[%c0_47, %c0_48] : memref<8x128xf32, #tpu.memory_space<vmem>>, vector<8x128xf32>
    tpu.vector_store %arg7[%c0_47, %c0_48], %196 {strides = array<i32>} : memref<8x128xf32, #tpu.memory_space<vmem>>, vector<8x128xf32>,
    return
  }
}

</mosaic_0001>

<bundles_post_ra>
// kernel: lstm_model_forward.1
= control target key start
LH: loop header
LB: loop body
LE: loop exit
PB: predicated region body
PF: predicated region fallthrough
CT: control target
= control target key end

     0   :  { %14 = vsyncpa [#allocation4], 0  ;;  %s2576_s0 = inlined_call_operand.vmem [shape: bf16[8,64], index: 0, kind: input, shape index: {}]   ;;  %s2577_s1 = inlined_call_operand.hbm [shape: bf16[64,512], index: 1, kind: input, shape index: {}]   ;;  %s2578_s2 = inlined_call_operand.hbm [shape: bf16[128,512], index: 2, kind: input, shape index: {}]   ;;  %s2579_s3 = inlined_call_operand.vmem [shape: f32[1,512], index: 3, kind: input, shape index: {}]   ;;  %s2580_s4 = inlined_call_operand.hbm [shape: bf16[128,128], index: 4, kind: input, shape index: {}]   ;;  %s2581_s5 = inlined_call_operand.vmem [shape: f32[1,128], index: 5, kind: input, shape index: {}]   ;;  %s2582_s6 = inlined_call_operand.vmem [shape: f32[2,128], index: 6, kind: input, shape index: {}]   ;;  %s2583_s7 = inlined_call_operand.vmem [shape: f32[8,128], index: 7, kind: output, shape index: {0}]   ;;  %s2584_s8 = inlined_call_operand.vmem [shape: f32[2,128], index: 8, kind: output, shape index: {1}]  }
   0x1   :  { %15 = vsyncpa [#allocation6], 0  ;;  %s2067_s27 = smov [#allocation5]   ;;  %s2068_s29 = smov [#allocation3]  }
   0x2   :  { %s35_s28 = sshll.u32 %s2067_s27, 4  ;;  %s23_s30 = sshll.u32 %s2068_s29, 4  ;;  %s36_s28 = int_to_ptr.vmem [resolvable:$true] %s35_s28  ;;  %s24_s30 = int_to_ptr.vmem [resolvable:$true] %s23_s30 }
   0x3   :  { %s2011_s9 = scalar_lea.vmem %s36_s28, 4096  ;;  %p2016_p1 = scmp.lt.s32.totalorder %s36_s28, %s36_s28 }
   0x4   :  { %p2012_p0 = scmp.ne.s32.totalorder %s36_s28, %s2011_s9  ;;  %p2017_p2 = scmp.lt.s32.totalorder %s2011_s9, %s2011_s9 }
   0x6   :  { %p2018_p3 = por %p2017_p2, %p2016_p1 }
   0x8   :  { %p2019_p4 = pnand %p2018_p3, %p2012_p0 }
   0xa   :  { %2022 = shalt.err (!%p2019_p4)
}
   0xb   :  { %s2069_s10 = smov 256   ;;  %s2070_s11 = smov 16  }
   0xc   :  { %41 = dma.hbm_to_vmem [thread:$0]  %s2578_s2, 4096, %s36_s28, [#allocation6], %s2069_s10, %s2069_s10, %s2070_s11  }
   0xd   :  { %s2031_s14 = scalar_lea.vmem %s24_s30, 2048  ;;  %p2036_p6 = scmp.lt.s32.totalorder %s24_s30, %s24_s30 }
   0xe   :  { %p2032_p5 = scmp.ne.s32.totalorder %s24_s30, %s2031_s14  ;;  %p2037_p7 = scmp.lt.s32.totalorder %s2031_s14, %s2031_s14 }
  0x10   :  { %p2038_p8 = por %p2037_p7, %p2036_p6 }
  0x12   :  { %p2039_p9 = pnand %p2038_p8, %p2032_p5 }
  0x14   :  { %2042 = shalt.err (!%p2039_p9)
}
  0x15   :  { %29 = dma.hbm_to_vmem [thread:$0]  %s2577_s1, 2048, %s24_s30, [#allocation4], %s2069_s10, %s2069_s10, %s2070_s11  }
  0x16   :  { %s2071_s17 = smov [#allocation7]  }
  0x17   :  { %s49_s18 = sshll.u32 %s2071_s17, 4  ;;  %s50_s18 = int_to_ptr.vmem [resolvable:$true] %s49_s18 }
  0x18   :  { %s2051_s19 = scalar_lea.vmem %s50_s18, 1024  ;;  %p2056_p11 = scmp.lt.s32.totalorder %s50_s18, %s50_s18 }
  0x19   :  { %p2052_p10 = scmp.ne.s32.totalorder %s50_s18, %s2051_s19  ;;  %p2057_p12 = scmp.lt.s32.totalorder %s2051_s19, %s2051_s19 }
  0x1b   :  { %p2058_p13 = por %p2057_p12, %p2056_p11 }
  0x1d   :  { %p2059_p0 = pnand %p2058_p13, %p2052_p10 }
  0x1f   :  { %2062 = shalt.err (!%p2059_p0)
}
  0x20   :  { %s2072_s2 = smov 64   ;;  %s2073_s20 = smov 4  }
  0x21   :  { %55 = dma.hbm_to_vmem [thread:$0]  %s2580_s4, 1024, %s50_s18, [#allocation6], %s2072_s2, %s2072_s2, %s2073_s20  }
  0x22   :  { %2063 = dma.done.wait [#allocation4], 2048  }
  0x23   :  { %2064 = vsyncadd [#allocation4], 4294965248 }
  0x24   :  { %2065 = dma.done.wait [#allocation6], 5120  }
  0x25   :  { %2066 = vsyncadd [#allocation6], 4294962176  ;;  %v2074_v0 = vmov 0   ;;  %v1759_v1 = vld [vmem:[#allocation3 + $0x64] ss:$16 sps:$4 sm:$0xff]   ;;  %vm189_vm0 = vcmask 523264   ;;  %v89_v55 = vlaneseq }
  0x26   :  { %225 = vmatprep.mubr.bf16.mxu1 %v2074_v0  ;;  %502 = vmatprep.mubr.bf16.mxu0 %v2074_v0  ;;  %v2133_v2 = vld [vmem:[#allocation5 + $0xe4] ss:$16 sps:$4 sm:$0xff]   ;;  %v1763_v3 = vld [vmem:[#allocation3 + $0x60] ss:$16 sps:$4 sm:$0xff]   ;;  %v1785_v17 = vld [vmem:[#allocation3 + $0x6c] ss:$16 sps:$4 sm:$0xff]  }
  0x27   :  { %201 = vmatprep.subr.bf16.mxu1 %v1759_v1  ;;  %v2135_v4 = vld [vmem:[#allocation5 + $0xe0] ss:$16 sps:$4 sm:$0xff]   ;;  %470 = vmatprep.subr.bf16.mxu0 %v2133_v2  ;;  %v1765_v5 = vld [vmem:[#allocation3 + $0x44] ss:$16 sps:$4 sm:$0xff]   ;;  %v70_v19 = vld [vmem:[%s2576_s0] sm:$0xf] }
  0x28   :  { %202 = vmatpush1.bf16.msra.mxu1 %v1763_v3  ;;  %471 = vmatpush1.bf16.msra.mxu0 %v2135_v4  ;;  %v2139_v6 = vld [vmem:[#allocation5 + $0xc4] ss:$16 sps:$4 sm:$0xff]   ;;  %v1769_v7 = vld [vmem:[#allocation3 + $0x40] ss:$16 sps:$4 sm:$0xff]   ;;  %v1783_v20 = vld [vmem:[#allocation3 + $0x68] ss:$16 sps:$4 sm:$0xff]  }
  0x29   :  { %203 = vmatprep.subr.bf16.mxu1 %v1765_v5  ;;  %v2141_v8 = vld [vmem:[#allocation5 + $0xc0] ss:$16 sps:$4 sm:$0xff]   ;;  %472 = vmatprep.subr.bf16.mxu0 %v2139_v6  ;;  %v1771_v9 = vld [vmem:[#allocation3 + $0x24] ss:$16 sps:$4 sm:$0xff]   ;;  %v1791_v22 = vld [vmem:[#allocation3 + $0x4c] ss:$16 sps:$4 sm:$0xff]  }
  0x2a   :  { %v2144_v10 = vld [vmem:[#allocation5 + $0xa4] ss:$16 sps:$4 sm:$0xff]   ;;  %v1775_v11 = vld [vmem:[#allocation3 + $0x20] ss:$16 sps:$4 sm:$0xff]   ;;  %v1789_v24 = vld [vmem:[#allocation3 + $0x48] ss:$16 sps:$4 sm:$0xff]  }
  0x2b   :  { %v2146_v12 = vld [vmem:[#allocation5 + $0xa0] ss:$16 sps:$4 sm:$0xff]   ;;  %v1777_v13 = vld [vmem:[#allocation3 + $0x4] ss:$16 sps:$4 sm:$0xff]   ;;  %v1797_v26 = vld [vmem:[#allocation3 + $0x2c] ss:$16 sps:$4 sm:$0xff]  }
  0x2c   :  { %204 = vmatpush1.bf16.msra.mxu1 %v1769_v7  ;;  %473 = vmatpush1.bf16.msra.mxu0 %v2141_v8  ;;  %v2150_v14 = vld [vmem:[#allocation5 + $0x84] ss:$16 sps:$4 sm:$0xff]   ;;  %v1781_v15 = vld [vmem:[#allocation3] ss:$16 sps:$4 sm:$0xff]   ;;  %v1795_v28 = vld [vmem:[#allocation3 + $0x28] ss:$16 sps:$4 sm:$0xff]  }
  0x2d   :  { %205 = vmatprep.subr.bf16.mxu1 %v1771_v9  ;;  %474 = vmatprep.subr.bf16.mxu0 %v2144_v10  ;;  %v2153_v16 = vld [vmem:[#allocation5 + $0x80] ss:$16 sps:$4 sm:$0xff]   ;;  %v2156_v18 = vld [vmem:[#allocation5 + $0x64] ss:$16 sps:$4 sm:$0xff]   ;;  %v1803_v30 = vld [vmem:[#allocation3 + $0xc] ss:$16 sps:$4 sm:$0xff]  }
  0x2e   :  { %v2162_v21 = vld [vmem:[#allocation5 + $0x60] ss:$16 sps:$4 sm:$0xff]   ;;  %v2165_v23 = vld [vmem:[#allocation5 + $0x44] ss:$16 sps:$4 sm:$0xff]   ;;  %v1801_v32 = vld [vmem:[#allocation3 + $0x8] ss:$16 sps:$4 sm:$0xff]  }
  0x2f   :  { %v2169_v25 = vld [vmem:[#allocation5 + $0x40] ss:$16 sps:$4 sm:$0xff]   ;;  %v2172_v27 = vld [vmem:[#allocation5 + $0x24] ss:$16 sps:$4 sm:$0xff]   ;;  %v307_v34 = vld [vmem:[%s2582_s6] sm:$0x1] }
  0x30   :  { %206 = vmatpush1.bf16.msra.mxu1 %v1775_v11  ;;  %475 = vmatpush1.bf16.msra.mxu0 %v2146_v12  ;;  %v2176_v29 = vld [vmem:[#allocation5 + $0x20] ss:$16 sps:$4 sm:$0xff]   ;;  %v2179_v31 = vld [vmem:[#allocation5 + $0x4] ss:$16 sps:$4 sm:$0xff]   ;;  %v2188_v35 = vld [vmem:[#allocation5 + $0xec] ss:$16 sps:$4 sm:$0xff]   ;;  %v309_v36 = vpack.c.bf16 %v307_v34, %v307_v34 }
  0x31   :  { %207 = vmatprep.subr.bf16.mxu1 %v1777_v13  ;;  %476 = vmatprep.subr.bf16.mxu0 %v2150_v14  ;;  %v2182_v33 = vld [vmem:[#allocation5] ss:$16 sps:$4 sm:$0xff]   ;;  %v2191_v37 = vld [vmem:[#allocation5 + $0xe8] ss:$16 sps:$4 sm:$0xff]   ;;  %v2193_v38 = vld [vmem:[#allocation5 + $0xcc] ss:$16 sps:$4 sm:$0xff]  }
  0x32   :  { %v2197_v39 = vld [vmem:[#allocation5 + $0xc8] ss:$16 sps:$4 sm:$0xff]   ;;  %v2200_v40 = vld [vmem:[#allocation5 + $0xac] ss:$16 sps:$4 sm:$0xff]   ;;  %v90_v57 = vshrl.u32 %v89_v55, 7  ;;  %vm2076_vm1 = vmmov 0  }
  0x33   :  { %v2209_v41 = vld [vmem:[#allocation5 + $0xa8] ss:$16 sps:$4 sm:$0xff]   ;;  %v2212_v42 = vld [vmem:[#allocation5 + $0x8c] ss:$16 sps:$4 sm:$0xff]   ;;  %vm1499_vm2 = vcmask 1040384  }
  0x34   :  { %208 = vmatpush1.bf16.msra.mxu1 %v1781_v15  ;;  %477 = vmatpush1.bf16.msra.mxu0 %v2153_v16  ;;  %v2217_v43 = vld [vmem:[#allocation5 + $0x88] ss:$16 sps:$4 sm:$0xff]   ;;  %v2220_v44 = vld [vmem:[#allocation5 + $0x6c] ss:$16 sps:$4 sm:$0xff]   ;;  %v91_v58 = vsub.s32 0, %v90_v57  ;;  %v95_v60 = vsub.s32 1, %v90_v57 }
  0x35   :  { %242 = vmatprep.subr.bf16.mxu1 %v1785_v17  ;;  %478 = vmatprep.subr.bf16.mxu0 %v2156_v18  ;;  %v2225_v45 = vld [vmem:[#allocation5 + $0x68] ss:$16 sps:$4 sm:$0xff]   ;;  %v2228_v46 = vld [vmem:[#allocation5 + $0x4c] ss:$16 sps:$4 sm:$0xff]  }
  0x36   :  { %v2233_v47 = vld [vmem:[#allocation5 + $0x48] ss:$16 sps:$4 sm:$0xff]   ;;  %v2236_v48 = vld [vmem:[#allocation5 + $0x2c] ss:$16 sps:$4 sm:$0xff]  }
  0x37   :  { %1653 = vmatmul.mubr.msk.bf16.vlgmr.msra.gmra.mxu1 %vm189_vm0, %v70_v19  ;;  %v2241_v49 = vld [vmem:[#allocation5 + $0x28] ss:$16 sps:$4 sm:$0xff]   ;;  %v2244_v50 = vld [vmem:[#allocation5 + $0xc] ss:$16 sps:$4 sm:$0xff]  }
  0x38   :  { %243 = vmatpush1.bf16.msra.mxu1 %v1783_v20  ;;  %479 = vmatpush1.bf16.msra.mxu0 %v2162_v21  ;;  %v2249_v51 = vld [vmem:[#allocation5 + $0x8] ss:$16 sps:$4 sm:$0xff]  }
  0x39   :  { %244 = vmatprep.subr.bf16.mxu1 %v1791_v22  ;;  %480 = vmatprep.subr.bf16.mxu0 %v2165_v23  ;;  %v87_v59 = vld [vmem:[%s2579_s3] sm:$0xf] }
  0x3a   :  { %266 = vmatprep.mubr.bf16.mxu1 %v2074_v0  ;;  %v92_v63 = vrot.slane %v87_v59, %v91_v58  ;;  %v96_v1 = vrot.slane %v87_v59, %v95_v60 }
  0x3c   :  { %245 = vmatpush1.bf16.msra.mxu1 %v1789_v24  ;;  %481 = vmatpush1.bf16.msra.mxu0 %v2169_v25 }
  0x3d   :  { %246 = vmatprep.subr.bf16.mxu1 %v1797_v26  ;;  %482 = vmatprep.subr.bf16.mxu0 %v2172_v27  ;;  %v99_v26 = vsub.s32 2, %v90_v57 }
  0x40   :  { %247 = vmatpush1.bf16.msra.mxu1 %v1795_v28  ;;  %483 = vmatpush1.bf16.msra.mxu0 %v2176_v29  ;;  %v103_v28 = vsub.s32 3, %v90_v57 }
  0x41   :  { %248 = vmatprep.subr.bf16.mxu1 %v1803_v30  ;;  %484 = vmatprep.subr.bf16.mxu0 %v2179_v31  ;;  %v100_v30 = vrot.slane %v87_v59, %v99_v26 }
  0x44   :  { %249 = vmatpush1.bf16.msra.mxu1 %v1801_v32  ;;  %485 = vmatpush1.bf16.msra.mxu0 %v2182_v33 }
  0x45   :  { %511 = vmatprep.subr.bf16.mxu1 %v2188_v35  ;;  %582 = vmatprep.subr.bf16.mxu0 %v2133_v2 }
  0x47   :  { %1654 = vmatmul.mubr.msk.bf16.vlgmr.msra.gmra.mxu1 %vm189_vm0, %v70_v19  ;;  %503 = vmatmul.mubr.bf16.vlgmr.msra.gmra.mxu0 %v309_v36 }
  0x48   :  { %512 = vmatpush1.bf16.msra.mxu1 %v2191_v37  ;;  %543 = vmatprep.mubr.bf16.mxu1 %v2074_v0 }
  0x49   :  { %513 = vmatprep.subr.bf16.mxu1 %v2193_v38  ;;  %583 = vmatpush1.bf16.msra.mxu0 %v2135_v4 }
  0x4a   :  { %584 = vmatprep.subr.bf16.mxu0 %v2139_v6  ;;  %614 = vmatprep.mubr.bf16.mxu0 %v2074_v0 }
  0x4c   :  { %514 = vmatpush1.bf16.msra.mxu1 %v2197_v39 }
  0x4d   :  { %515 = vmatprep.subr.bf16.mxu1 %v2200_v40  ;;  %585 = vmatpush1.bf16.msra.mxu0 %v2141_v8 }
  0x4e   :  { %586 = vmatprep.subr.bf16.mxu0 %v2144_v10 }
  0x50   :  { %516 = vmatpush1.bf16.msra.mxu1 %v2209_v41 }
  0x51   :  { %517 = vmatprep.subr.bf16.mxu1 %v2212_v42  ;;  %587 = vmatpush1.bf16.msra.mxu0 %v2146_v12 }
  0x52   :  { %588 = vmatprep.subr.bf16.mxu0 %v2150_v14 }
  0x54   :  { %518 = vmatpush1.bf16.msra.mxu1 %v2217_v43 }
  0x55   :  { %519 = vmatprep.subr.bf16.mxu1 %v2220_v44  ;;  %589 = vmatpush1.bf16.msra.mxu0 %v2153_v16 }
  0x56   :  { %590 = vmatprep.subr.bf16.mxu0 %v2156_v18 }
  0x58   :  { %520 = vmatpush1.bf16.msra.mxu1 %v2225_v45 }
  0x59   :  { %521 = vmatprep.subr.bf16.mxu1 %v2228_v46  ;;  %591 = vmatpush1.bf16.msra.mxu0 %v2162_v21 }
  0x5a   :  { %592 = vmatprep.subr.bf16.mxu0 %v2165_v23 }
  0x5c   :  { %522 = vmatpush1.bf16.msra.mxu1 %v2233_v47 }
  0x5d   :  { %523 = vmatprep.subr.bf16.mxu1 %v2236_v48  ;;  %593 = vmatpush1.bf16.msra.mxu0 %v2169_v25 }
  0x5e   :  { %594 = vmatprep.subr.bf16.mxu0 %v2172_v27 }
  0x60   :  { %524 = vmatpush1.bf16.msra.mxu1 %v2241_v49 }
  0x61   :  { %525 = vmatprep.subr.bf16.mxu1 %v2244_v50  ;;  %595 = vmatpush1.bf16.msra.mxu0 %v2176_v29 }
  0x62   :  { %596 = vmatprep.subr.bf16.mxu0 %v2179_v31 }
  0x64   :  { %526 = vmatpush1.bf16.msra.mxu1 %v2249_v51 }
  0x65   :  { %623 = vmatprep.subr.bf16.mxu1 %v2188_v35  ;;  %597 = vmatpush1.bf16.msra.mxu0 %v2182_v33 }
  0x66   :  { %713 = vmatprep.subr.bf16.mxu0 %v2133_v2 }
  0x67   :  { %544 = vmatmul.mubr.bf16.vlgmr.msra.gmra.mxu1 %v309_v36  ;;  %v104_v36 = vrot.slane %v87_v59, %v103_v28 }
  0x68   :  { %624 = vmatpush1.bf16.msra.mxu1 %v2191_v37  ;;  %655 = vmatprep.mubr.bf16.mxu1 %v2074_v0 }
  0x69   :  { %625 = vmatprep.subr.bf16.mxu1 %v2193_v38 }
  0x6c   :  { %626 = vmatpush1.bf16.msra.mxu1 %v2197_v39 }
  0x6d   :  { %627 = vmatprep.subr.bf16.mxu1 %v2200_v40 }
  0x70   :  { %628 = vmatpush1.bf16.msra.mxu1 %v2209_v41 }
  0x71   :  { %629 = vmatprep.subr.bf16.mxu1 %v2212_v42 }
  0x74   :  { %630 = vmatpush1.bf16.msra.mxu1 %v2217_v43 }
  0x75   :  { %631 = vmatprep.subr.bf16.mxu1 %v2220_v44 }
  0x78   :  { %632 = vmatpush1.bf16.msra.mxu1 %v2225_v45 }
  0x79   :  { %633 = vmatprep.subr.bf16.mxu1 %v2228_v46 }
  0x7c   :  { %634 = vmatpush1.bf16.msra.mxu1 %v2233_v47 }
  0x7d   :  { %635 = vmatprep.subr.bf16.mxu1 %v2236_v48 }
  0x80   :  { %636 = vmatpush1.bf16.msra.mxu1 %v2241_v49 }
  0x81   :  { %637 = vmatprep.subr.bf16.mxu1 %v2244_v50 }
  0x84   :  { %638 = vmatpush1.bf16.msra.mxu1 %v2249_v51 }
  0x85   :  { %754 = vmatprep.subr.bf16.mxu1 %v2188_v35 }
  0xf7   :  { %v227_v52 = vpop.f32.mrf.mxu1 }
  0xf8   :  { %v2278_v11 = vadd.f32 %v227_v52, %v92_v63 }
  0xf9   :  { %v229_v53 = vpop.f32.mrf.mxu1 }
  0xfa   :  { %v2280_v13 = vadd.f32 %v229_v53, %v96_v1 }
  0xfb   :  { %v231_v54 = vpop.f32.mrf.mxu1 }
  0xfd   :  { %v232_v56 = vpop.f32.mrf.mxu1 }
 0x107   :  { %v268_v61 = vpop.f32.mrf.mxu1  ;;  %v504_v62 = vpop.f32.mrf.mxu0 }
 0x108   :  { %v552_v19 = vadd.f32 %v504_v62, %v2278_v11  ;;  %v2284_v52 = vadd.f32 %v268_v61, %v100_v30 }
 0x109   :  { %v270_v3 = vpop.f32.mrf.mxu1  ;;  %v506_v5 = vpop.f32.mrf.mxu0 }
 0x10a   :  { %v553_v20 = vadd.f32 %v506_v5, %v2280_v13  ;;  %v1687_v22 = vmul.f32 -1.442695, %v552_v19  ;;  %v2286_v56 = vadd.f32 %v270_v3, %v104_v36  ;;  %v308_v5 = vld [vmem:[%s2582_s6 + $0x1] sm:$0x1] }
 0x10b   :  { %v272_v7 = vpop.f32.mrf.mxu1  ;;  %v508_v9 = vpop.f32.mrf.mxu0 }
 0x10c   :  { %v1688_v24 = vmul.f32 -1.442695, %v553_v20  ;;  %1839 = vpow2.f32 %v1687_v22 }
 0x10d   :  { %v273_v15 = vpop.f32.mrf.mxu1  ;;  %v509_v17 = vpop.f32.mrf.mxu0 }
 0x10e   :  { %1841 = vpow2.f32 %v1688_v24 }
 0x119   :  { %v1840_v32 = vpop.eup %1839 }
 0x11a   :  { %v565_v53 = vadd.f32 1.0, %v1840_v32 }
 0x11b   :  { %v1842_v34 = vpop.eup %1841 }
 0x11c   :  { %v566_v54 = vadd.f32 1.0, %v1842_v34  ;;  %1843 = vrcp.f32 %v565_v53 }
 0x11e   :  { %1845 = vrcp.f32 %v566_v54 }
 0x127   :  { %v545_v55 = vpop.f32.mrf.mxu1 }
 0x128   :  { %v554_v58 = vadd.f32 %v545_v55, %v2284_v52 }
 0x129   :  { %v547_v60 = vpop.f32.mrf.mxu1  ;;  %v1844_v59 = vpop.eup %1843 }
 0x12a   :  { %v1689_v62 = vmul.f32 -1.442695, %v554_v58  ;;  %v555_v63 = vadd.f32 %v547_v60, %v2286_v56 }
 0x12b   :  { %v549_v57 = vpop.f32.mrf.mxu1  ;;  %v1846_v61 = vpop.eup %1845 }
 0x12c   :  { %1847 = vpow2.f32 %v1689_v62  ;;  %v575_v15 = vmul.f32 %v1846_v61, %v308_v5 }
 0x12d   :  { %1849 = vtanh.f32 %v555_v63  ;;  %v550_v1 = vpop.f32.mrf.mxu1 }
 0x139   :  { %v1848_v3 = vpop.eup %1847 }
 0x13a   :  { %v1850_v7 = vpop.eup %1849  ;;  %v567_v9 = vadd.f32 1.0, %v1848_v3 }
 0x13b   :  { %v576_v17 = vmul.f32 %v1850_v7, %v1844_v59 }
 0x13c   :  { %1851 = vrcp.f32 %v567_v9 }
 0x13d   :  { %v2293_v19 = vadd.f32 %v576_v17, %v575_v15 }
 0x13f   :  { %1853 = vtanh.f32 %v2293_v19 }
 0x149   :  { %v1852_v20 = vpop.eup %1851 }
 0x14c   :  { %v1854_v22 = vpop.eup %1853 }
 0x14d   :  { %v579_v24 = vmul.f32 %v1854_v22, %v1852_v20 }
 0x14f   :  { %580 = vst [vmem:[#allocation2] sm:$0x1] %v579_v24  ;;  %v581_v26 = vpack.c.bf16 %v579_v24, %v579_v24 }
 0x151   :  { %615 = vmatmul.mubr.bf16.vlgmr.msra.gmra.mxu0 %v581_v26  ;;  %656 = vmatmul.mubr.bf16.vlgmr.msra.gmra.mxu1 %v581_v26 }
 0x152   :  { %714 = vmatpush1.bf16.msra.mxu0 %v2135_v4  ;;  %755 = vmatpush1.bf16.msra.mxu1 %v2191_v37 }
 0x153   :  { %715 = vmatprep.subr.bf16.mxu0 %v2139_v6  ;;  %756 = vmatprep.subr.bf16.mxu1 %v2193_v38 }
 0x154   :  { %745 = vmatprep.mubr.bf16.mxu0 %v2074_v0  ;;  %786 = vmatprep.mubr.bf16.mxu1 %v2074_v0 }
 0x156   :  { %716 = vmatpush1.bf16.msra.mxu0 %v2141_v8  ;;  %757 = vmatpush1.bf16.msra.mxu1 %v2197_v39 }
 0x157   :  { %717 = vmatprep.subr.bf16.mxu0 %v2144_v10  ;;  %758 = vmatprep.subr.bf16.mxu1 %v2200_v40 }
 0x15a   :  { %718 = vmatpush1.bf16.msra.mxu0 %v2146_v12  ;;  %759 = vmatpush1.bf16.msra.mxu1 %v2209_v41 }
 0x15b   :  { %719 = vmatprep.subr.bf16.mxu0 %v2150_v14  ;;  %760 = vmatprep.subr.bf16.mxu1 %v2212_v42 }
 0x15e   :  { %720 = vmatpush1.bf16.msra.mxu0 %v2153_v16  ;;  %761 = vmatpush1.bf16.msra.mxu1 %v2217_v43 }
 0x15f   :  { %721 = vmatprep.subr.bf16.mxu0 %v2156_v18  ;;  %762 = vmatprep.subr.bf16.mxu1 %v2220_v44 }
 0x162   :  { %722 = vmatpush1.bf16.msra.mxu0 %v2162_v21  ;;  %763 = vmatpush1.bf16.msra.mxu1 %v2225_v45 }
 0x163   :  { %723 = vmatprep.subr.bf16.mxu0 %v2165_v23  ;;  %764 = vmatprep.subr.bf16.mxu1 %v2228_v46 }
 0x166   :  { %724 = vmatpush1.bf16.msra.mxu0 %v2169_v25  ;;  %765 = vmatpush1.bf16.msra.mxu1 %v2233_v47 }
 0x167   :  { %725 = vmatprep.subr.bf16.mxu0 %v2172_v27  ;;  %766 = vmatprep.subr.bf16.mxu1 %v2236_v48 }
 0x16a   :  { %726 = vmatpush1.bf16.msra.mxu0 %v2176_v29  ;;  %767 = vmatpush1.bf16.msra.mxu1 %v2241_v49 }
 0x16b   :  { %727 = vmatprep.subr.bf16.mxu0 %v2179_v31  ;;  %768 = vmatprep.subr.bf16.mxu1 %v2244_v50 }
 0x16e   :  { %728 = vmatpush1.bf16.msra.mxu0 %v2182_v33  ;;  %769 = vmatpush1.bf16.msra.mxu1 %v2249_v51 }
 0x16f   :  { %843 = vmatprep.subr.bf16.mxu0 %v2133_v2  ;;  %884 = vmatprep.subr.bf16.mxu1 %v2188_v35 }
 0x211   :  { %v616_v28 = vpop.f32.mrf.mxu0  ;;  %v657_v30 = vpop.f32.mrf.mxu1 }
 0x212   :  { %v668_v32 = vrot.slane %v616_v28, 7  ;;  %v670_v59 = vrot.slane %v657_v30, 7  ;;  %v700_v28 = vrot.slane %v2293_v19, 7 }
 0x213   :  { %v618_v34 = vpop.f32.mrf.mxu0  ;;  %v659_v36 = vpop.f32.mrf.mxu1 }
 0x214   :  { %v676_v53 = vadd.f32 %v668_v32, %v2278_v11  ;;  %v669_v54 = vrot.slane %v618_v34, 7  ;;  %v678_v61 = vadd.f32 %v670_v59, %v2284_v52  ;;  %v671_v5 = vrot.slane %v659_v36, 7 }
 0x215   :  { %v620_v55 = vpop.f32.mrf.mxu0  ;;  %v661_v58 = vpop.f32.mrf.mxu1 }
 0x216   :  { %v1690_v60 = vmul.f32 -1.442695, %v676_v53  ;;  %v677_v62 = vadd.f32 %v669_v54, %v2280_v13  ;;  %v1692_v3 = vmul.f32 -1.442695, %v678_v61  ;;  %v679_v9 = vadd.f32 %v671_v5, %v2286_v56 }
 0x217   :  { %v621_v63 = vpop.f32.mrf.mxu0  ;;  %v662_v57 = vpop.f32.mrf.mxu1 }
 0x218   :  { %1855 = vpow2.f32 %v1690_v60  ;;  %v1691_v1 = vmul.f32 -1.442695, %v677_v62 }
 0x21a   :  { %1857 = vpow2.f32 %v1691_v1 }
 0x21b   :  { %1859 = vpow2.f32 %v1692_v3 }
 0x225   :  { %v1856_v7 = vpop.eup %1855 }
 0x226   :  { %v689_v15 = vadd.f32 1.0, %v1856_v7 }
 0x227   :  { %v1858_v17 = vpop.eup %1857 }
 0x228   :  { %1861 = vrcp.f32 %v689_v15  ;;  %v690_v20 = vadd.f32 1.0, %v1858_v17  ;;  %v1860_v22 = vpop.eup %1859 }
 0x229   :  { %1863 = vtanh.f32 %v679_v9  ;;  %v691_v32 = vadd.f32 1.0, %v1860_v22 }
 0x22a   :  { %1865 = vrcp.f32 %v690_v20 }
 0x22b   :  { %1867 = vrcp.f32 %v691_v32 }
 0x235   :  { %v1862_v24 = vpop.eup %1861 }
 0x236   :  { %v1864_v26 = vpop.eup %1863 }
 0x237   :  { %v1866_v30 = vpop.eup %1865  ;;  %v703_v36 = vmul.f32 %v1864_v26, %v1862_v24 }
 0x238   :  { %v702_v34 = vmul.f32 %v1866_v30, %v700_v28  ;;  %v1868_v54 = vpop.eup %1867 }
 0x23a   :  { %v2335_v53 = vadd.f32 %v703_v36, %v702_v34 }
 0x23c   :  { %1869 = vtanh.f32 %v2335_v53 }
 0x249   :  { %v1870_v55 = vpop.eup %1869 }
 0x24a   :  { %v706_v58 = vmul.f32 %v1870_v55, %v1868_v54 }
 0x24c   :  { %707 = vst [vmem:[#allocation2] sm:$0x2] %v706_v58  ;;  %v708_v60 = vpack.c.bf16 %v706_v58, %v706_v58 }
 0x24e   :  { %v710_v62 = vshrl.u32 %v708_v60, 16 }
 0x250   :  { %746 = vmatmul.mubr.bf16.vlgmr.msra.gmra.mxu0 %v710_v62  ;;  %787 = vmatmul.mubr.bf16.vlgmr.msra.gmra.mxu1 %v710_v62 }
 0x251   :  { %844 = vmatpush1.bf16.msra.mxu0 %v2135_v4  ;;  %885 = vmatpush1.bf16.msra.mxu1 %v2191_v37 }
 0x252   :  { %845 = vmatprep.subr.bf16.mxu0 %v2139_v6  ;;  %886 = vmatprep.subr.bf16.mxu1 %v2193_v38 }
 0x253   :  { %875 = vmatprep.mubr.bf16.mxu0 %v2074_v0  ;;  %916 = vmatprep.mubr.bf16.mxu1 %v2074_v0 }
 0x255   :  { %846 = vmatpush1.bf16.msra.mxu0 %v2141_v8  ;;  %887 = vmatpush1.bf16.msra.mxu1 %v2197_v39 }
 0x256   :  { %847 = vmatprep.subr.bf16.mxu0 %v2144_v10  ;;  %888 = vmatprep.subr.bf16.mxu1 %v2200_v40 }
 0x259   :  { %848 = vmatpush1.bf16.msra.mxu0 %v2146_v12  ;;  %889 = vmatpush1.bf16.msra.mxu1 %v2209_v41 }
 0x25a   :  { %849 = vmatprep.subr.bf16.mxu0 %v2150_v14  ;;  %890 = vmatprep.subr.bf16.mxu1 %v2212_v42 }
 0x25d   :  { %850 = vmatpush1.bf16.msra.mxu0 %v2153_v16  ;;  %891 = vmatpush1.bf16.msra.mxu1 %v2217_v43 }
 0x25e   :  { %851 = vmatprep.subr.bf16.mxu0 %v2156_v18  ;;  %892 = vmatprep.subr.bf16.mxu1 %v2220_v44 }
 0x261   :  { %852 = vmatpush1.bf16.msra.mxu0 %v2162_v21  ;;  %893 = vmatpush1.bf16.msra.mxu1 %v2225_v45 }
 0x262   :  { %853 = vmatprep.subr.bf16.mxu0 %v2165_v23  ;;  %894 = vmatprep.subr.bf16.mxu1 %v2228_v46 }
 0x265   :  { %854 = vmatpush1.bf16.msra.mxu0 %v2169_v25  ;;  %895 = vmatpush1.bf16.msra.mxu1 %v2233_v47 }
 0x266   :  { %855 = vmatprep.subr.bf16.mxu0 %v2172_v27  ;;  %896 = vmatprep.subr.bf16.mxu1 %v2236_v48 }
 0x269   :  { %856 = vmatpush1.bf16.msra.mxu0 %v2176_v29  ;;  %897 = vmatpush1.bf16.msra.mxu1 %v2241_v49 }
 0x26a   :  { %857 = vmatprep.subr.bf16.mxu0 %v2179_v31  ;;  %898 = vmatprep.subr.bf16.mxu1 %v2244_v50 }
 0x26d   :  { %858 = vmatpush1.bf16.msra.mxu0 %v2182_v33  ;;  %899 = vmatpush1.bf16.msra.mxu1 %v2249_v51 }
 0x26e   :  { %975 = vmatprep.subr.bf16.mxu0 %v2133_v2  ;;  %1016 = vmatprep.subr.bf16.mxu1 %v2188_v35 }
 0x310   :  { %v747_v19 = vpop.f32.mrf.mxu0  ;;  %v788_v63 = vpop.f32.mrf.mxu1 }
 0x311   :  { %v799_v57 = vrot.slane %v747_v19, 6  ;;  %v801_v24 = vrot.slane %v788_v63, 6  ;;  %v831_v19 = vrot.slane %v2335_v53, 7 }
 0x312   :  { %v749_v1 = vpop.f32.mrf.mxu0  ;;  %v790_v59 = vpop.f32.mrf.mxu1 }
 0x313   :  { %v807_v61 = vadd.f32 %v799_v57, %v2278_v11  ;;  %v800_v5 = vrot.slane %v749_v1, 6  ;;  %v809_v26 = vadd.f32 %v801_v24, %v2284_v52  ;;  %v802_v28 = vrot.slane %v790_v59, 6 }
 0x314   :  { %v751_v3 = vpop.f32.mrf.mxu0  ;;  %v792_v7 = vpop.f32.mrf.mxu1 }
 0x315   :  { %v1693_v9 = vmul.f32 -1.442695, %v807_v61  ;;  %v808_v15 = vadd.f32 %v800_v5, %v2280_v13  ;;  %v1695_v30 = vmul.f32 -1.442695, %v809_v26  ;;  %v810_v34 = vadd.f32 %v802_v28, %v2286_v56 }
 0x316   :  { %v752_v17 = vpop.f32.mrf.mxu0  ;;  %v793_v20 = vpop.f32.mrf.mxu1 }
 0x317   :  { %1871 = vpow2.f32 %v1693_v9  ;;  %v1694_v22 = vmul.f32 -1.442695, %v808_v15 }
 0x319   :  { %1873 = vpow2.f32 %v1694_v22 }
 0x31a   :  { %1875 = vpow2.f32 %v1695_v30 }
 0x324   :  { %v1872_v32 = vpop.eup %1871 }
 0x325   :  { %v820_v36 = vadd.f32 1.0, %v1872_v32 }
 0x326   :  { %v1874_v54 = vpop.eup %1873 }
 0x327   :  { %1877 = vrcp.f32 %v820_v36  ;;  %v821_v55 = vadd.f32 1.0, %v1874_v54  ;;  %v1876_v58 = vpop.eup %1875 }
 0x328   :  { %1879 = vtanh.f32 %v810_v34  ;;  %v822_v57 = vadd.f32 1.0, %v1876_v58 }
 0x329   :  { %1881 = vrcp.f32 %v821_v55 }
 0x32a   :  { %1883 = vrcp.f32 %v822_v57 }
 0x334   :  { %v1878_v60 = vpop.eup %1877 }
 0x335   :  { %v1880_v62 = vpop.eup %1879 }
 0x336   :  { %v1882_v63 = vpop.eup %1881  ;;  %v834_v59 = vmul.f32 %v1880_v62, %v1878_v60 }
 0x337   :  { %v833_v1 = vmul.f32 %v1882_v63, %v831_v19  ;;  %v1884_v5 = vpop.eup %1883 }
 0x339   :  { %v2377_v61 = vadd.f32 %v834_v59, %v833_v1 }
 0x33b   :  { %1885 = vtanh.f32 %v2377_v61 }
 0x348   :  { %v1886_v3 = vpop.eup %1885 }
 0x349   :  { %v837_v7 = vmul.f32 %v1886_v3, %v1884_v5 }
 0x34b   :  { %838 = vst [vmem:[#allocation2] sm:$0x4] %v837_v7  ;;  %v839_v9 = vpack.c.bf16 %v837_v7, %v837_v7 }
 0x34d   :  { %v841_v15 = vrot.slane %v839_v9, 1 }
 0x34f   :  { %876 = vmatmul.mubr.bf16.vlgmr.msra.gmra.mxu0 %v841_v15  ;;  %917 = vmatmul.mubr.bf16.vlgmr.msra.gmra.mxu1 %v841_v15  ;;  %v961_v15 = vrot.slane %v2377_v61, 7 }
 0x350   :  { %976 = vmatpush1.bf16.msra.mxu0 %v2135_v4  ;;  %1017 = vmatpush1.bf16.msra.mxu1 %v2191_v37 }
 0x351   :  { %977 = vmatprep.subr.bf16.mxu0 %v2139_v6  ;;  %1018 = vmatprep.subr.bf16.mxu1 %v2193_v38 }
 0x352   :  { %1007 = vmatprep.mubr.bf16.mxu0 %v2074_v0  ;;  %1048 = vmatprep.mubr.bf16.mxu1 %v2074_v0 }
 0x354   :  { %978 = vmatpush1.bf16.msra.mxu0 %v2141_v8  ;;  %1019 = vmatpush1.bf16.msra.mxu1 %v2197_v39 }
 0x355   :  { %979 = vmatprep.subr.bf16.mxu0 %v2144_v10  ;;  %1020 = vmatprep.subr.bf16.mxu1 %v2200_v40 }
 0x358   :  { %980 = vmatpush1.bf16.msra.mxu0 %v2146_v12  ;;  %1021 = vmatpush1.bf16.msra.mxu1 %v2209_v41 }
 0x359   :  { %981 = vmatprep.subr.bf16.mxu0 %v2150_v14  ;;  %1022 = vmatprep.subr.bf16.mxu1 %v2212_v42 }
 0x35c   :  { %982 = vmatpush1.bf16.msra.mxu0 %v2153_v16  ;;  %1023 = vmatpush1.bf16.msra.mxu1 %v2217_v43 }
 0x35d   :  { %983 = vmatprep.subr.bf16.mxu0 %v2156_v18  ;;  %1024 = vmatprep.subr.bf16.mxu1 %v2220_v44 }
 0x360   :  { %984 = vmatpush1.bf16.msra.mxu0 %v2162_v21  ;;  %1025 = vmatpush1.bf16.msra.mxu1 %v2225_v45 }
 0x361   :  { %985 = vmatprep.subr.bf16.mxu0 %v2165_v23  ;;  %1026 = vmatprep.subr.bf16.mxu1 %v2228_v46 }
 0x364   :  { %986 = vmatpush1.bf16.msra.mxu0 %v2169_v25  ;;  %1027 = vmatpush1.bf16.msra.mxu1 %v2233_v47 }
 0x365   :  { %987 = vmatprep.subr.bf16.mxu0 %v2172_v27  ;;  %1028 = vmatprep.subr.bf16.mxu1 %v2236_v48 }
 0x368   :  { %988 = vmatpush1.bf16.msra.mxu0 %v2176_v29  ;;  %1029 = vmatpush1.bf16.msra.mxu1 %v2241_v49 }
 0x369   :  { %989 = vmatprep.subr.bf16.mxu0 %v2179_v31  ;;  %1030 = vmatprep.subr.bf16.mxu1 %v2244_v50 }
 0x36c   :  { %990 = vmatpush1.bf16.msra.mxu0 %v2182_v33  ;;  %1031 = vmatpush1.bf16.msra.mxu1 %v2249_v51 }
 0x36d   :  { %1105 = vmatprep.subr.bf16.mxu0 %v2133_v2  ;;  %1146 = vmatprep.subr.bf16.mxu1 %v2188_v35 }
 0x40f   :  { %v877_v53 = vpop.f32.mrf.mxu0  ;;  %v918_v17 = vpop.f32.mrf.mxu1 }
 0x410   :  { %v929_v20 = vrot.slane %v877_v53, 5  ;;  %v931_v2 = vrot.slane %v918_v17, 5 }
 0x411   :  { %v879_v22 = vpop.f32.mrf.mxu0  ;;  %v920_v24 = vpop.f32.mrf.mxu1 }
 0x412   :  { %v937_v26 = vadd.f32 %v929_v20, %v2278_v11  ;;  %v930_v28 = vrot.slane %v879_v22, 5  ;;  %v939_v60 = vadd.f32 %v931_v2, %v2284_v52  ;;  %v932_v62 = vrot.slane %v920_v24, 5 }
 0x413   :  { %v881_v30 = vpop.f32.mrf.mxu0  ;;  %v922_v32 = vpop.f32.mrf.mxu1 }
 0x414   :  { %v1696_v34 = vmul.f32 -1.442695, %v937_v26  ;;  %v938_v36 = vadd.f32 %v930_v28, %v2280_v13  ;;  %v1698_v19 = vmul.f32 -1.442695, %v939_v60  ;;  %v940_v57 = vadd.f32 %v932_v62, %v2286_v56 }
 0x415   :  { %v882_v54 = vpop.f32.mrf.mxu0  ;;  %v923_v55 = vpop.f32.mrf.mxu1 }
 0x416   :  { %1887 = vpow2.f32 %v1696_v34  ;;  %v1697_v58 = vmul.f32 -1.442695, %v938_v36 }
 0x418   :  { %1889 = vpow2.f32 %v1697_v58 }
 0x419   :  { %1891 = vpow2.f32 %v1698_v19 }
 0x423   :  { %v1888_v63 = vpop.eup %1887 }
 0x424   :  { %v950_v1 = vadd.f32 1.0, %v1888_v63 }
 0x425   :  { %v1890_v59 = vpop.eup %1889 }
 0x426   :  { %1893 = vrcp.f32 %v950_v1  ;;  %v951_v5 = vadd.f32 1.0, %v1890_v59  ;;  %v1892_v3 = vpop.eup %1891 }
 0x427   :  { %1895 = vtanh.f32 %v940_v57  ;;  %v952_v17 = vadd.f32 1.0, %v1892_v3 }
 0x428   :  { %1897 = vrcp.f32 %v951_v5 }
 0x429   :  { %1899 = vrcp.f32 %v952_v17 }
 0x433   :  { %v1894_v7 = vpop.eup %1893 }
 0x434   :  { %v1896_v9 = vpop.eup %1895 }
 0x435   :  { %v1898_v53 = vpop.eup %1897  ;;  %v964_v22 = vmul.f32 %v1896_v9, %v1894_v7 }
 0x436   :  { %v963_v20 = vmul.f32 %v1898_v53, %v961_v15  ;;  %v1900_v26 = vpop.eup %1899 }
 0x438   :  { %v2419_v24 = vadd.f32 %v964_v22, %v963_v20 }
 0x43a   :  { %1901 = vtanh.f32 %v2419_v24  ;;  %v1093_v59 = vrot.slane %v2419_v24, 7  ;;  %v2470_v24 = vld [vmem:[#allocation5 + $0xc4] ss:$16 sps:$4 sm:$0xff]  }
 0x447   :  { %v1902_v28 = vpop.eup %1901 }
 0x448   :  { %v967_v30 = vmul.f32 %v1902_v28, %v1900_v26  ;;  %v2466_v28 = vld [vmem:[#allocation5 + $0xe0] ss:$16 sps:$4 sm:$0xff]  }
 0x44a   :  { %968 = vst [vmem:[#allocation2] sm:$0x8] %v967_v30  ;;  %v969_v32 = vpack.c.bf16 %v967_v30, %v967_v30  ;;  %v2476_v30 = vld [vmem:[#allocation5 + $0xc0] ss:$16 sps:$4 sm:$0xff]  }
 0x44c   :  { %v971_v34 = vshrl.u32 %v969_v32, 16  ;;  %v2480_v32 = vld [vmem:[#allocation5 + $0xa4] ss:$16 sps:$4 sm:$0xff]  }
 0x44e   :  { %v973_v36 = vrot.slane %v971_v34, 1  ;;  %v2492_v34 = vld [vmem:[#allocation5 + $0x80] ss:$16 sps:$4 sm:$0xff]  }
 0x450   :  { %1008 = vmatmul.mubr.bf16.vlgmr.msra.gmra.mxu0 %v973_v36  ;;  %1049 = vmatmul.mubr.bf16.vlgmr.msra.gmra.mxu1 %v973_v36 }
 0x451   :  { %1106 = vmatpush1.bf16.msra.mxu0 %v2135_v4  ;;  %1147 = vmatpush1.bf16.msra.mxu1 %v2191_v37  ;;  %v2454_v4 = vld [vmem:[#allocation5 + $0xe4] ss:$16 sps:$4 sm:$0xff]  }
 0x452   :  { %1107 = vmatprep.subr.bf16.mxu0 %v2139_v6  ;;  %1148 = vmatprep.subr.bf16.mxu1 %v2193_v38 }
 0x453   :  { %1137 = vmatprep.mubr.bf16.mxu0 %v2074_v0  ;;  %1178 = vmatprep.mubr.bf16.mxu1 %v2074_v0 }
 0x455   :  { %1108 = vmatpush1.bf16.msra.mxu0 %v2141_v8  ;;  %1149 = vmatpush1.bf16.msra.mxu1 %v2197_v39 }
 0x456   :  { %1109 = vmatprep.subr.bf16.mxu0 %v2144_v10  ;;  %1150 = vmatprep.subr.bf16.mxu1 %v2200_v40 }
 0x459   :  { %1110 = vmatpush1.bf16.msra.mxu0 %v2146_v12  ;;  %1151 = vmatpush1.bf16.msra.mxu1 %v2209_v41 }
 0x45a   :  { %1111 = vmatprep.subr.bf16.mxu0 %v2150_v14  ;;  %1152 = vmatprep.subr.bf16.mxu1 %v2212_v42 }
 0x45d   :  { %1112 = vmatpush1.bf16.msra.mxu0 %v2153_v16  ;;  %1153 = vmatpush1.bf16.msra.mxu1 %v2217_v43 }
 0x45e   :  { %1113 = vmatprep.subr.bf16.mxu0 %v2156_v18  ;;  %1154 = vmatprep.subr.bf16.mxu1 %v2220_v44 }
 0x461   :  { %1114 = vmatpush1.bf16.msra.mxu0 %v2162_v21  ;;  %1155 = vmatpush1.bf16.msra.mxu1 %v2225_v45 }
 0x462   :  { %1115 = vmatprep.subr.bf16.mxu0 %v2165_v23  ;;  %1156 = vmatprep.subr.bf16.mxu1 %v2228_v46 }
 0x465   :  { %1116 = vmatpush1.bf16.msra.mxu0 %v2169_v25  ;;  %1157 = vmatpush1.bf16.msra.mxu1 %v2233_v47 }
 0x466   :  { %1117 = vmatprep.subr.bf16.mxu0 %v2172_v27  ;;  %1158 = vmatprep.subr.bf16.mxu1 %v2236_v48 }
 0x469   :  { %1118 = vmatpush1.bf16.msra.mxu0 %v2176_v29  ;;  %1159 = vmatpush1.bf16.msra.mxu1 %v2241_v49 }
 0x46a   :  { %1119 = vmatprep.subr.bf16.mxu0 %v2179_v31  ;;  %1160 = vmatprep.subr.bf16.mxu1 %v2244_v50 }
 0x46d   :  { %1120 = vmatpush1.bf16.msra.mxu0 %v2182_v33  ;;  %1161 = vmatpush1.bf16.msra.mxu1 %v2249_v51 }
 0x46e   :  { %1237 = vmatprep.subr.bf16.mxu0 %v2454_v4  ;;  %1278 = vmatprep.subr.bf16.mxu1 %v2188_v35 }
 0x510   :  { %v1009_v6 = vpop.f32.mrf.mxu0  ;;  %v1050_v8 = vpop.f32.mrf.mxu1 }
 0x511   :  { %v1061_v10 = vrot.slane %v1009_v6, 4  ;;  %v1063_v61 = vrot.slane %v1050_v8, 4 }
 0x512   :  { %v1011_v12 = vpop.f32.mrf.mxu0  ;;  %v1052_v14 = vpop.f32.mrf.mxu1 }
 0x513   :  { %v1069_v16 = vadd.f32 %v1061_v10, %v2278_v11  ;;  %v1062_v18 = vrot.slane %v1011_v12, 4  ;;  %v1071_v35 = vadd.f32 %v1063_v61, %v2284_v52  ;;  %v1064_v54 = vrot.slane %v1052_v14, 4 }
 0x514   :  { %v1013_v21 = vpop.f32.mrf.mxu0  ;;  %v1054_v23 = vpop.f32.mrf.mxu1 }
 0x515   :  { %v1699_v25 = vmul.f32 -1.442695, %v1069_v16  ;;  %v1070_v27 = vadd.f32 %v1062_v18, %v2280_v13  ;;  %v1701_v55 = vmul.f32 -1.442695, %v1071_v35  ;;  %v1072_v2 = vadd.f32 %v1064_v54, %v2286_v56 }
 0x516   :  { %v1014_v29 = vpop.f32.mrf.mxu0  ;;  %v1055_v31 = vpop.f32.mrf.mxu1 }
 0x517   :  { %1903 = vpow2.f32 %v1699_v25  ;;  %v1700_v33 = vmul.f32 -1.442695, %v1070_v27 }
 0x519   :  { %1905 = vpow2.f32 %v1700_v33 }
 0x51a   :  { %1907 = vpow2.f32 %v1701_v55 }
 0x524   :  { %v1904_v58 = vpop.eup %1903 }
 0x525   :  { %v1082_v60 = vadd.f32 1.0, %v1904_v58 }
 0x526   :  { %v1906_v62 = vpop.eup %1905 }
 0x527   :  { %1909 = vrcp.f32 %v1082_v60  ;;  %v1083_v19 = vadd.f32 1.0, %v1906_v62  ;;  %v1908_v63 = vpop.eup %1907 }
 0x528   :  { %1911 = vtanh.f32 %v1072_v2  ;;  %v1084_v3 = vadd.f32 1.0, %v1908_v63 }
 0x529   :  { %1913 = vrcp.f32 %v1083_v19 }
 0x52a   :  { %1915 = vrcp.f32 %v1084_v3 }
 0x534   :  { %v1910_v57 = vpop.eup %1909 }
 0x535   :  { %v1912_v1 = vpop.eup %1911 }
 0x536   :  { %v1914_v5 = vpop.eup %1913  ;;  %v1096_v9 = vmul.f32 %v1912_v1, %v1910_v57 }
 0x537   :  { %v1095_v7 = vmul.f32 %v1914_v5, %v1093_v59  ;;  %v1916_v53 = vpop.eup %1915 }
 0x539   :  { %v2463_v15 = vadd.f32 %v1096_v9, %v1095_v7 }
 0x53b   :  { %1917 = vtanh.f32 %v2463_v15  ;;  %v1223_v60 = vrot.slane %v2463_v15, 7  ;;  %v1988_v15 = vld [vmem:[#allocation5 + $0xe8] ss:$16 sps:$4 sm:$0xff]  }
 0x548   :  { %v1918_v17 = vpop.eup %1917 }
 0x549   :  { %v1099_v20 = vmul.f32 %v1918_v17, %v1916_v53  ;;  %v1989_v17 = vld [vmem:[#allocation5 + $0xcc] ss:$16 sps:$4 sm:$0xff]  }
 0x54b   :  { %1100 = vst [vmem:[#allocation2] sm:$0x10] %v1099_v20  ;;  %v1101_v22 = vpack.c.bf16 %v1099_v20, %v1099_v20  ;;  %v1990_v20 = vld [vmem:[#allocation5 + $0xc8] ss:$16 sps:$4 sm:$0xff]  }
 0x54d   :  { %v1103_v26 = vrot.slane %v1101_v22, 2  ;;  %v1991_v22 = vld [vmem:[#allocation5 + $0xac] ss:$16 sps:$4 sm:$0xff]  }
 0x54f   :  { %1138 = vmatmul.mubr.bf16.vlgmr.msra.gmra.mxu0 %v1103_v26  ;;  %1179 = vmatmul.mubr.bf16.vlgmr.msra.gmra.mxu1 %v1103_v26  ;;  %v1992_v26 = vld [vmem:[#allocation5 + $0xa8] ss:$16 sps:$4 sm:$0xff]  }
 0x550   :  { %1238 = vmatpush1.bf16.msra.mxu0 %v2466_v28  ;;  %1279 = vmatpush1.bf16.msra.mxu1 %v2191_v37  ;;  %v2484_v37 = vld [vmem:[#allocation5 + $0xa0] ss:$16 sps:$4 sm:$0xff]  }
 0x551   :  { %1239 = vmatprep.subr.bf16.mxu0 %v2470_v24  ;;  %1280 = vmatprep.subr.bf16.mxu1 %v2193_v38  ;;  %v2488_v38 = vld [vmem:[#allocation5 + $0x84] ss:$16 sps:$4 sm:$0xff]  }
 0x552   :  { %1269 = vmatprep.mubr.bf16.mxu0 %v2074_v0  ;;  %1310 = vmatprep.mubr.bf16.mxu1 %v2074_v0 }
 0x554   :  { %1240 = vmatpush1.bf16.msra.mxu0 %v2476_v30  ;;  %1281 = vmatpush1.bf16.msra.mxu1 %v2197_v39  ;;  %v2496_v39 = vld [vmem:[#allocation5 + $0x64] ss:$16 sps:$4 sm:$0xff]  }
 0x555   :  { %1241 = vmatprep.subr.bf16.mxu0 %v2480_v32  ;;  %1282 = vmatprep.subr.bf16.mxu1 %v2200_v40  ;;  %v2500_v40 = vld [vmem:[#allocation5 + $0x60] ss:$16 sps:$4 sm:$0xff]  }
 0x558   :  { %1242 = vmatpush1.bf16.msra.mxu0 %v2484_v37  ;;  %1283 = vmatpush1.bf16.msra.mxu1 %v2209_v41  ;;  %v2504_v41 = vld [vmem:[#allocation5 + $0x44] ss:$16 sps:$4 sm:$0xff]  }
 0x559   :  { %1243 = vmatprep.subr.bf16.mxu0 %v2488_v38  ;;  %1284 = vmatprep.subr.bf16.mxu1 %v2212_v42  ;;  %v2508_v42 = vld [vmem:[#allocation5 + $0x40] ss:$16 sps:$4 sm:$0xff]  }
 0x55c   :  { %1244 = vmatpush1.bf16.msra.mxu0 %v2492_v34  ;;  %1285 = vmatpush1.bf16.msra.mxu1 %v2217_v43  ;;  %v2512_v43 = vld [vmem:[#allocation5 + $0x24] ss:$16 sps:$4 sm:$0xff]  }
 0x55d   :  { %1245 = vmatprep.subr.bf16.mxu0 %v2496_v39  ;;  %1286 = vmatprep.subr.bf16.mxu1 %v2220_v44  ;;  %v2516_v44 = vld [vmem:[#allocation5 + $0x20] ss:$16 sps:$4 sm:$0xff]  }
 0x560   :  { %1246 = vmatpush1.bf16.msra.mxu0 %v2500_v40  ;;  %1287 = vmatpush1.bf16.msra.mxu1 %v2225_v45  ;;  %v2520_v45 = vld [vmem:[#allocation5 + $0x4] ss:$16 sps:$4 sm:$0xff]  }
 0x561   :  { %1247 = vmatprep.subr.bf16.mxu0 %v2504_v41  ;;  %1288 = vmatprep.subr.bf16.mxu1 %v2228_v46  ;;  %v2524_v46 = vld [vmem:[#allocation5] ss:$16 sps:$4 sm:$0xff]  }
 0x564   :  { %1248 = vmatpush1.bf16.msra.mxu0 %v2508_v42  ;;  %1289 = vmatpush1.bf16.msra.mxu1 %v2233_v47  ;;  %v1987_v47 = vld [vmem:[#allocation5 + $0xec] ss:$16 sps:$4 sm:$0xff]  }
 0x565   :  { %1249 = vmatprep.subr.bf16.mxu0 %v2512_v43  ;;  %1290 = vmatprep.subr.bf16.mxu1 %v2236_v48 }
 0x568   :  { %1250 = vmatpush1.bf16.msra.mxu0 %v2516_v44  ;;  %1291 = vmatpush1.bf16.msra.mxu1 %v2241_v49 }
 0x569   :  { %1251 = vmatprep.subr.bf16.mxu0 %v2520_v45  ;;  %1292 = vmatprep.subr.bf16.mxu1 %v2244_v50 }
 0x56c   :  { %1252 = vmatpush1.bf16.msra.mxu0 %v2524_v46  ;;  %1293 = vmatpush1.bf16.msra.mxu1 %v2249_v51 }
 0x56d   :  { %1367 = vmatprep.subr.bf16.mxu0 %v2454_v4  ;;  %1408 = vmatprep.subr.bf16.mxu1 %v1987_v47 }
 0x60f   :  { %v1139_v48 = vpop.f32.mrf.mxu0  ;;  %v1180_v36 = vpop.f32.mrf.mxu1 }
 0x610   :  { %v1191_v6 = vrot.slane %v1139_v48, 3  ;;  %v1193_v4 = vrot.slane %v1180_v36, 3 }
 0x611   :  { %v1141_v49 = vpop.f32.mrf.mxu0  ;;  %v1182_v8 = vpop.f32.mrf.mxu1 }
 0x612   :  { %v1199_v10 = vadd.f32 %v1191_v6, %v2278_v11  ;;  %v1192_v12 = vrot.slane %v1141_v49, 3  ;;  %v1201_v25 = vadd.f32 %v1193_v4, %v2284_v52  ;;  %v1194_v27 = vrot.slane %v1182_v8, 3 }
 0x613   :  { %v1143_v14 = vpop.f32.mrf.mxu0  ;;  %v1184_v50 = vpop.f32.mrf.mxu1 }
 0x614   :  { %v1702_v16 = vmul.f32 -1.442695, %v1199_v10  ;;  %v1200_v18 = vadd.f32 %v1192_v12, %v2280_v13  ;;  %v1704_v29 = vmul.f32 -1.442695, %v1201_v25  ;;  %v1202_v33 = vadd.f32 %v1194_v27, %v2286_v56 }
 0x615   :  { %v1144_v21 = vpop.f32.mrf.mxu0  ;;  %v1185_v23 = vpop.f32.mrf.mxu1 }
 0x616   :  { %1919 = vpow2.f32 %v1702_v16  ;;  %v1703_v51 = vmul.f32 -1.442695, %v1200_v18 }
 0x618   :  { %1921 = vpow2.f32 %v1703_v51 }
 0x619   :  { %1923 = vpow2.f32 %v1704_v29 }
 0x623   :  { %v1920_v31 = vpop.eup %1919 }
 0x624   :  { %v1212_v61 = vadd.f32 1.0, %v1920_v31 }
 0x625   :  { %v1922_v35 = vpop.eup %1921 }
 0x626   :  { %1925 = vrcp.f32 %v1212_v61  ;;  %v1213_v54 = vadd.f32 1.0, %v1922_v35  ;;  %v1924_v55 = vpop.eup %1923 }
 0x627   :  { %1927 = vtanh.f32 %v1202_v33  ;;  %v1214_v19 = vadd.f32 1.0, %v1924_v55 }
 0x628   :  { %1929 = vrcp.f32 %v1213_v54 }
 0x629   :  { %1931 = vrcp.f32 %v1214_v19 }
 0x633   :  { %v1926_v58 = vpop.eup %1925 }
 0x634   :  { %v1928_v2 = vpop.eup %1927 }
 0x635   :  { %v1930_v62 = vpop.eup %1929  ;;  %v1226_v57 = vmul.f32 %v1928_v2, %v1926_v58 }
 0x636   :  { %v1225_v63 = vmul.f32 %v1930_v62, %v1223_v60  ;;  %v1932_v59 = vpop.eup %1931 }
 0x638   :  { %v2534_v1 = vadd.f32 %v1226_v57, %v1225_v63  ;;  %v1831_v57 = vld [vmem:[#allocation7 + $0x38] sm:$0xff]  }
 0x63a   :  { %1933 = vtanh.f32 %v2534_v1  ;;  %v1355_v33 = vrot.slane %v2534_v1, 7  ;;  %v1832_v1 = vld [vmem:[#allocation7 + $0x30] sm:$0xff]  }
 0x647   :  { %v1934_v5 = vpop.eup %1933 }
 0x648   :  { %v1229_v3 = vmul.f32 %v1934_v5, %v1932_v59  ;;  %v2075_v59 = vmov 0.0   ;;  %v1833_v5 = vld [vmem:[#allocation7 + $0x28] sm:$0xff]  }
 0x64a   :  { %1230 = vst [vmem:[#allocation2] sm:$0x20] %v1229_v3  ;;  %v1231_v7 = vpack.c.bf16 %v1229_v3, %v1229_v3  ;;  %v1834_v3 = vld [vmem:[#allocation7 + $0x20] sm:$0xff]  }
 0x64c   :  { %v1233_v9 = vshrl.u32 %v1231_v7, 16  ;;  %v1835_v7 = vld [vmem:[#allocation7 + $0x18] sm:$0xff]  }
 0x64e   :  { %v1235_v53 = vrot.slane %v1233_v9, 2  ;;  %v1836_v9 = vld [vmem:[#allocation7 + $0x10] sm:$0xff]  }
 0x650   :  { %1270 = vmatmul.mubr.bf16.vlgmr.msra.gmra.mxu0 %v1235_v53  ;;  %1311 = vmatmul.mubr.bf16.vlgmr.msra.gmra.mxu1 %v1235_v53  ;;  %v1837_v53 = vld [vmem:[#allocation7 + $0x8] sm:$0xff]  }
 0x651   :  { %1368 = vmatpush1.bf16.msra.mxu0 %v2466_v28  ;;  %1409 = vmatpush1.bf16.msra.mxu1 %v1988_v15  ;;  %v1993_v28 = vld [vmem:[#allocation5 + $0x8c] ss:$16 sps:$4 sm:$0xff]   ;;  %v1838_v15 = vld [vmem:[#allocation7] sm:$0xff]  }
 0x652   :  { %1369 = vmatprep.subr.bf16.mxu0 %v2470_v24  ;;  %1410 = vmatprep.subr.bf16.mxu1 %v1989_v17  ;;  %v1994_v24 = vld [vmem:[#allocation5 + $0x88] ss:$16 sps:$4 sm:$0xff]  }
 0x653   :  { %1399 = vmatprep.mubr.bf16.mxu0 %v2074_v0  ;;  %1440 = vmatprep.mubr.bf16.mxu1 %v2074_v0  ;;  %v1995_v0 = vld [vmem:[#allocation5 + $0x6c] ss:$16 sps:$4 sm:$0xff]  }
 0x655   :  { %1370 = vmatpush1.bf16.msra.mxu0 %v2476_v30  ;;  %1411 = vmatpush1.bf16.msra.mxu1 %v1990_v20  ;;  %v1996_v30 = vld [vmem:[#allocation5 + $0x68] ss:$16 sps:$4 sm:$0xff]  }
 0x656   :  { %1371 = vmatprep.subr.bf16.mxu0 %v2480_v32  ;;  %1412 = vmatprep.subr.bf16.mxu1 %v1991_v22  ;;  %v1997_v32 = vld [vmem:[#allocation5 + $0x4c] ss:$16 sps:$4 sm:$0xff]  }
 0x659   :  { %1372 = vmatpush1.bf16.msra.mxu0 %v2484_v37  ;;  %1413 = vmatpush1.bf16.msra.mxu1 %v1992_v26  ;;  %v1998_v37 = vld [vmem:[#allocation5 + $0x48] ss:$16 sps:$4 sm:$0xff]  }
 0x65a   :  { %1373 = vmatprep.subr.bf16.mxu0 %v2488_v38  ;;  %1414 = vmatprep.subr.bf16.mxu1 %v1993_v28  ;;  %v1999_v38 = vld [vmem:[#allocation5 + $0x2c] ss:$16 sps:$4 sm:$0xff]  }
 0x65d   :  { %1374 = vmatpush1.bf16.msra.mxu0 %v2492_v34  ;;  %1415 = vmatpush1.bf16.msra.mxu1 %v1994_v24  ;;  %v2000_v34 = vld [vmem:[#allocation5 + $0x28] ss:$16 sps:$4 sm:$0xff]  }
 0x65e   :  { %1375 = vmatprep.subr.bf16.mxu0 %v2496_v39  ;;  %1416 = vmatprep.subr.bf16.mxu1 %v1995_v0  ;;  %v2001_v39 = vld [vmem:[#allocation5 + $0xc] ss:$16 sps:$4 sm:$0xff]  }
 0x661   :  { %1376 = vmatpush1.bf16.msra.mxu0 %v2500_v40  ;;  %1417 = vmatpush1.bf16.msra.mxu1 %v1996_v30  ;;  %v2002_v40 = vld [vmem:[#allocation5 + $0x8] ss:$16 sps:$4 sm:$0xff]  }
 0x662   :  { %1377 = vmatprep.subr.bf16.mxu0 %v2504_v41  ;;  %1418 = vmatprep.subr.bf16.mxu1 %v1997_v32 }
 0x665   :  { %1378 = vmatpush1.bf16.msra.mxu0 %v2508_v42  ;;  %1419 = vmatpush1.bf16.msra.mxu1 %v1998_v37 }
 0x666   :  { %1379 = vmatprep.subr.bf16.mxu0 %v2512_v43  ;;  %1420 = vmatprep.subr.bf16.mxu1 %v1999_v38 }
 0x669   :  { %1380 = vmatpush1.bf16.msra.mxu0 %v2516_v44  ;;  %1421 = vmatpush1.bf16.msra.mxu1 %v2000_v34 }
 0x66a   :  { %1381 = vmatprep.subr.bf16.mxu0 %v2520_v45  ;;  %1422 = vmatprep.subr.bf16.mxu1 %v2001_v39 }
 0x66d   :  { %1382 = vmatpush1.bf16.msra.mxu0 %v2524_v46  ;;  %1423 = vmatpush1.bf16.msra.mxu1 %v2002_v40 }
 0x66e   :  { %1729 = vmatprep.subr.bf16.mxu0 %v2075_v59 }
 0x710   :  { %v1271_v41 = vpop.f32.mrf.mxu0  ;;  %v1312_v42 = vpop.f32.mrf.mxu1 }
 0x711   :  { %v1323_v47 = vrot.slane %v1271_v41, 2  ;;  %v1325_v46 = vrot.slane %v1312_v42, 2 }
 0x712   :  { %v1273_v48 = vpop.f32.mrf.mxu0  ;;  %v1314_v36 = vpop.f32.mrf.mxu1 }
 0x713   :  { %v1331_v43 = vadd.f32 %v1323_v47, %v2278_v11  ;;  %v1324_v6 = vrot.slane %v1273_v48, 2  ;;  %v1333_v50 = vadd.f32 %v1325_v46, %v2284_v52  ;;  %v1326_v16 = vrot.slane %v1314_v36, 2 }
 0x714   :  { %v1275_v49 = vpop.f32.mrf.mxu0  ;;  %v1316_v44 = vpop.f32.mrf.mxu1 }
 0x715   :  { %v1705_v8 = vmul.f32 -1.442695, %v1331_v43  ;;  %v1332_v10 = vadd.f32 %v1324_v6, %v2280_v13  ;;  %v1707_v18 = vmul.f32 -1.442695, %v1333_v50  ;;  %v1334_v23 = vadd.f32 %v1326_v16, %v2286_v56 }
 0x716   :  { %v1276_v45 = vpop.f32.mrf.mxu0  ;;  %v1317_v12 = vpop.f32.mrf.mxu1 }
 0x717   :  { %1935 = vpow2.f32 %v1705_v8  ;;  %v1706_v14 = vmul.f32 -1.442695, %v1332_v10 }
 0x719   :  { %1937 = vpow2.f32 %v1706_v14 }
 0x71a   :  { %1939 = vpow2.f32 %v1707_v18 }
 0x724   :  { %v1936_v21 = vpop.eup %1935 }
 0x725   :  { %v1344_v51 = vadd.f32 1.0, %v1936_v21 }
 0x726   :  { %v1938_v4 = vpop.eup %1937 }
 0x727   :  { %1941 = vrcp.f32 %v1344_v51  ;;  %v1345_v25 = vadd.f32 1.0, %v1938_v4  ;;  %v1940_v27 = vpop.eup %1939 }
 0x728   :  { %1943 = vtanh.f32 %v1334_v23  ;;  %v1346_v35 = vadd.f32 1.0, %v1940_v27 }
 0x729   :  { %1945 = vrcp.f32 %v1345_v25  ;;  %v1711_v25 = vld [vmem:[%s2581_s5] ss:$0 sm:$0xff] }
 0x72a   :  { %1947 = vrcp.f32 %v1346_v35 }
 0x734   :  { %v1942_v29 = vpop.eup %1941 }
 0x735   :  { %v1944_v31 = vpop.eup %1943 }
 0x736   :  { %v1946_v61 = vpop.eup %1945  ;;  %v1358_v55 = vmul.f32 %v1944_v31, %v1942_v29 }
 0x737   :  { %v1357_v54 = vmul.f32 %v1946_v61, %v1355_v33  ;;  %v1948_v2 = vpop.eup %1947 }
 0x739   :  { %v2559_v58 = vadd.f32 %v1358_v55, %v1357_v54 }
 0x73b   :  { %1949 = vtanh.f32 %v2559_v58  ;;  %v1485_v10 = vrot.slane %v2559_v58, 7 }
 0x748   :  { %v1950_v60 = vpop.eup %1949 }
 0x749   :  { %v1361_v62 = vmul.f32 %v1950_v60, %v1948_v2 }
 0x74b   :  { %1362 = vst [vmem:[#allocation2] sm:$0x40] %v1361_v62  ;;  %v1363_v19 = vpack.c.bf16 %v1361_v62, %v1361_v62 }
 0x74d   :  { %v1365_v63 = vrot.slane %v1363_v19, 3 }
 0x74f   :  { %1400 = vmatmul.mubr.bf16.vlgmr.msra.gmra.mxu0 %v1365_v63  ;;  %1441 = vmatmul.mubr.bf16.vlgmr.msra.gmra.mxu1 %v1365_v63 }
 0x750   :  { %1730 = vmatpush3.bf16.msra.mxu0 %v1831_v57  ;;  %1745 = vmatprep.mubr.msk.bf16.mxu0 %vm2076_vm1, %v2075_v59 }
 0x751   :  { %1731 = vmatprep.subr.bf16.mxu0 %v2075_v59 }
 0x754   :  { %1732 = vmatpush3.bf16.msra.mxu0 %v1832_v1 }
 0x755   :  { %1733 = vmatprep.subr.bf16.mxu0 %v2075_v59 }
 0x758   :  { %1734 = vmatpush3.bf16.msra.mxu0 %v1833_v5 }
 0x759   :  { %1735 = vmatprep.subr.bf16.mxu0 %v2075_v59 }
 0x75c   :  { %1736 = vmatpush3.bf16.msra.mxu0 %v1834_v3 }
 0x75d   :  { %1737 = vmatprep.subr.bf16.mxu0 %v2075_v59 }
 0x760   :  { %1738 = vmatpush3.bf16.msra.mxu0 %v1835_v7 }
 0x761   :  { %1739 = vmatprep.subr.bf16.mxu0 %v2075_v59 }
 0x764   :  { %1740 = vmatpush3.bf16.msra.mxu0 %v1836_v9 }
 0x765   :  { %1741 = vmatprep.subr.bf16.mxu0 %v2075_v59 }
 0x768   :  { %1742 = vmatpush3.bf16.msra.mxu0 %v1837_v53 }
 0x769   :  { %1743 = vmatprep.subr.bf16.mxu0 %v2075_v59 }
 0x76c   :  { %1744 = vmatpush3.bf16.msra.mxu0 %v1838_v15 }
 0x80f   :  { %v1401_v17 = vpop.f32.mrf.mxu0  ;;  %v1442_v20 = vpop.f32.mrf.mxu1 }
 0x810   :  { %v1453_v22 = vrot.slane %v1401_v17, 1  ;;  %v1455_v41 = vrot.slane %v1442_v20, 1 }
 0x811   :  { %v1403_v26 = vpop.f32.mrf.mxu0  ;;  %v1444_v28 = vpop.f32.mrf.mxu1 }
 0x812   :  { %v1461_v24 = vadd.f32 %v1453_v22, %v2278_v11  ;;  %v1454_v0 = vrot.slane %v1403_v26, 1  ;;  %v1463_v42 = vadd.f32 %v1455_v41, %v2284_v52  ;;  %v1456_v47 = vrot.slane %v1444_v28, 1 }
 0x813   :  { %v1405_v30 = vpop.f32.mrf.mxu0  ;;  %v1446_v32 = vpop.f32.mrf.mxu1 }
 0x814   :  { %v1708_v37 = vmul.f32 -1.442695, %v1461_v24  ;;  %v1462_v38 = vadd.f32 %v1454_v0, %v2280_v13  ;;  %v1710_v48 = vmul.f32 -1.442695, %v1463_v42  ;;  %v1464_v43 = vadd.f32 %v1456_v47, %v2286_v56 }
 0x815   :  { %v1406_v34 = vpop.f32.mrf.mxu0  ;;  %v1447_v39 = vpop.f32.mrf.mxu1 }
 0x816   :  { %1951 = vpow2.f32 %v1708_v37  ;;  %v1709_v40 = vmul.f32 -1.442695, %v1462_v38 }
 0x818   :  { %1953 = vpow2.f32 %v1709_v40 }
 0x819   :  { %1955 = vpow2.f32 %v1710_v48 }
 0x823   :  { %v1952_v36 = vpop.eup %1951 }
 0x824   :  { %v1474_v11 = vadd.f32 1.0, %v1952_v36 }
 0x825   :  { %v1954_v6 = vpop.eup %1953 }
 0x826   :  { %1957 = vrcp.f32 %v1474_v11  ;;  %v1475_v49 = vadd.f32 1.0, %v1954_v6  ;;  %v1956_v13 = vpop.eup %1955 }
 0x827   :  { %1959 = vtanh.f32 %v1464_v43  ;;  %v1476_v12 = vadd.f32 1.0, %v1956_v13 }
 0x828   :  { %1961 = vrcp.f32 %v1475_v49 }
 0x829   :  { %1963 = vrcp.f32 %v1476_v12 }
 0x833   :  { %v1958_v44 = vpop.eup %1957 }
 0x834   :  { %v1960_v8 = vpop.eup %1959 }
 0x835   :  { %v1962_v45 = vpop.eup %1961  ;;  %v1488_v14 = vmul.f32 %v1960_v8, %v1958_v44 }
 0x836   :  { %v1487_v52 = vmul.f32 %v1962_v45, %v1485_v10  ;;  %v1964_v56 = vpop.eup %1963 }
 0x838   :  { %v1489_v46 = vadd.f32 %v1488_v14, %v1487_v52 }
 0x83a   :  { %1965 = vtanh.f32 %v1489_v46  ;;  %v1497_v21 = vrot.slane %v1489_v46, 6 }
 0x847   :  { %v1966_v50 = vpop.eup %1965 }
 0x848   :  { %v1491_v16 = vmul.f32 %v1966_v50, %v1964_v56 }
 0x84a   :  { %1492 = vst [vmem:[#allocation2] sm:$0x80] %v1491_v16  ;;  %v1494_v18 = vrot.slane %v1491_v16, 7 }
 0x84c   :  { %v1500_v23 = vsel %vm1499_vm2, %v1494_v18, %v1497_v21 }
 0x84d   :  { %1501 = vst [vmem:[%s2584_s8] sm:$0x3] %v1500_v23 }
 0x851   :  { %v1502_v51 = vld [vmem:[#allocation2] sm:$0xff] }
 0x852   :  { %v1503_v4 = vpack.c.bf16 %v1502_v51, %v1502_v51 }
 0x854   :  { %1746 = vmatmul.mubr.bf16.vlgmr.msra.gmra.mxu0 %v1503_v4 }
 0x914   :  { %v1609_v27 = vpop.f32.mrf.mxu0 }
 0x915   :  { %v1610_v29 = vadd.f32 %v1711_v25, %v1609_v27 }
 0x916   :  { %v1747_v31 = vpop.f32.mrf.mxu0 }
 0x917   :  { %1615 = vmax.xlane.f32.xlu0 %v1610_v29 }
 0x918   :  { %v1612_v33 = vpop.f32.mrf.mxu0 }
 0x91a   :  { %v1748_v61 = vpop.f32.mrf.mxu0 }
 0x9a0   :  { %v1616_v35 = vpop.xlane.xlu0 %1615 }
 0x9a1   :  { %v1617_v54 = vsub.f32 %v1610_v29, %v1616_v35 }
 0x9a3   :  { %v1618_v55 = vmul.f32 1.442695, %v1617_v54 }
 0x9a5   :  { %1967 = vpow2.f32 %v1618_v55 }
 0x9b2   :  { %v1968_v58 = vpop.eup %1967 }
 0x9b3   :  { %1620 = vadd.xlane.f32.xlu0 %v1968_v58 }
 0xa3c   :  { %v1621_v2 = vpop.xlane.xlu0 %1620 }
 0xa3d   :  { %1969 = vlog2.f32 %v1621_v2 }
 0xa4a   :  { %v1970_v60 = vpop.eup %1969 }
 0xa4b   :  { %v1623_v62 = vmul.f32 0.6931472, %v1970_v60 }
 0xa4d   :  { %v1624_v19 = vadd.f32 %v1623_v62, %v1616_v35 }
 0xa4f   :  { %v1625_v63 = vsub.f32 %v1610_v29, %v1624_v19 }
 0xa51   :  { %1626 = vst [vmem:[%s2583_s7] sm:$0xff] %v1625_v63 }
 0xa52   :  { %1635 = vsyncpa [#allocation4], 1 }
 0xa53   :  { %1636 = vsyncpa [#allocation6], 1 }

</bundles_post_ra>
